<compile_context>
chip_gen: v7x
topology: tpu7x:2x2x1
jax: 0.10.0
libtpu: 0.0.40
codegen_flags: <defaults>
</compile_context>

<pallas_src>
import functools
import math

import jax
import jax.numpy as jnp
from jax import lax
from jax.experimental import pallas as pl
from jax.experimental.pallas import tpu as pltpu

VMEM = pl.BlockSpec(memory_space=pltpu.MemorySpace.VMEM)
NEG_INF = -1e30


# ----------------------------------------------------------------------------
# Fused forward kernel
# ----------------------------------------------------------------------------
def _masked_softmax(logits, mask):
    e = jnp.where(mask, logits, NEG_INF)
    m = jnp.max(e, axis=-1, keepdims=True)
    p = jnp.where(mask, jnp.exp(e - m), 0.0)
    denom = jnp.maximum(jnp.sum(p, axis=-1, keepdims=True), 1e-16)
    # approx reciprocal issues on the otherwise-idle EUP slot
    return p * pl.reciprocal(denom, approx=True)


def _fused_forward_kernel(
        # drug branch
        drug_x_ref, drug_adj_ref, mean_ref, conv3_w_ref, conv3_b_ref,
        # mlp branch
        xd_ref, xm_ref, mlp1_w_ref, mlp1_b_ref, mlp2_w_ref, mlp2_b_ref,
        # GAT
        gat_w_ref, gat_att_ref, gat_b_ref, adj_gat_ref,
        # TransformerConv blocks
        tf1_w_ref, tf1_b_ref, tf2_w_ref, tf2_b_ref, adj_tf_ref,
        # edge gather (one-hot)
        sel_a_ref, sel_b_ref,
        # output
        o_ref,
        *, gat_heads, gat_dim, tf1_heads, tf1_dim, tf2_heads, tf2_dim):
    f32 = jnp.float32

    # ---- conv3: GCNConv(58, hidden) -> relu -> per-drug mean (batched) -----
    h = jnp.dot(drug_x_ref[...], conv3_w_ref[...], preferred_element_type=f32)
    h = jnp.dot(drug_adj_ref[...], h, preferred_element_type=f32) + conv3_b_ref[...]
    h = jnp.maximum(h, 0.0)
    matrix = jnp.dot(mean_ref[...], h, preferred_element_type=f32)   # (n_drugs, hidden)

    # ---- mlp1 / mlp2 + blend ------------------------------------------------
    xd = jnp.dot(xd_ref[...], mlp1_w_ref[...], preferred_element_type=f32)
    xd = jnp.maximum(xd + mlp1_b_ref[...], 0.0)
    xd = (xd + matrix) * 0.5
    xm = jnp.dot(xm_ref[...], mlp2_w_ref[...], preferred_element_type=f32)
    xm = jnp.maximum(xm + mlp2_b_ref[...], 0.0)
    x = jnp.concatenate([xd, xm], axis=0)                            # (N, hidden)

    # ---- conv1: GATConv(hidden, hidden, heads=4, concat=True) -> relu ------
    xw = jnp.dot(x, gat_w_ref[...], preferred_element_type=f32)       # (N, H*C)
    # a_src / a_dst for all heads via one matmul against block-diag att matrix
    att = jnp.dot(xw, gat_att_ref[...], preferred_element_type=f32)   # (N, 2H)
    att_t = jnp.transpose(att)                                        # (2H, N)
    gat_mask = adj_gat_ref[...] > 0.0
    outs = []
    for hh in range(gat_heads):
        sl = slice(hh * gat_dim, (hh + 1) * gat_dim)
        xh = xw[:, sl]
        a_src_row = att_t[2 * hh:2 * hh + 1, :]                       # (1, N)
        a_dst_col = att[:, 2 * hh + 1:2 * hh + 2]                     # (N, 1)
        e = a_dst_col + a_src_row                                     # e[i,j]=a_d[i]+a_s[j]
        e = jnp.where(e > 0, e, 0.2 * e)                              # LeakyReLU(0.2)
        alpha = _masked_softmax(e, gat_mask)
        outs.append(jnp.dot(alpha, xh, preferred_element_type=f32))
    x = jnp.concatenate(outs, axis=-1) + gat_b_ref[...]               # one full-width value
    x = jnp.maximum(x, 0.0)

    # ---- convtf1 / convtf2: TransformerConv (merged q|k|v|skip projection) --
    # TODO(synk): dropout=0.1 on attention weights is a training-only op; no-op here.
    tf_mask = adj_tf_ref[...] > 0.0

    def tf_block(x_in, w_ref, b_ref, heads, dim, relu):
        f_out = heads * dim
        proj = jnp.dot(x_in, w_ref[...], preferred_element_type=f32) + b_ref[...]
        q = proj[:, 0:f_out]
        k = proj[:, f_out:2 * f_out]
        v = proj[:, 2 * f_out:3 * f_out]
        skip = proj[:, 3 * f_out:4 * f_out]
        scale = 1.0 / math.sqrt(dim)
        outs = []
        for hh in range(heads):
            sl = slice(hh * dim, (hh + 1) * dim)
            qh, kh, vh = q[:, sl], k[:, sl], v[:, sl]
            s = lax.dot_general(qh, kh, (((1,), (1,)), ((), ())),
                                preferred_element_type=f32) * scale   # q @ k^T
            alpha = _masked_softmax(s, tf_mask)
            outs.append(jnp.dot(alpha, vh, preferred_element_type=f32) + skip[:, sl])
        out = jnp.concatenate(outs, axis=-1)
        if relu:
            out = jnp.maximum(out, 0.0)
        return out

    x = tf_block(x, tf1_w_ref, tf1_b_ref, tf1_heads, tf1_dim, relu=True)
    x = tf_block(x, tf2_w_ref, tf2_b_ref, tf2_heads, tf2_dim, relu=False)

    # ---- edge scores: gathers via one-hot matmuls, lane-dense output --------
    xa = jnp.dot(sel_a_ref[...], x, preferred_element_type=f32)
    xb = jnp.dot(sel_b_ref[...], x, preferred_element_type=f32)
    scores = jnp.sum(xa * xb, axis=-1, keepdims=True)                 # (n_e_pad, 1)
    o_ref[...] = jnp.broadcast_to(scores, o_ref.shape)                # (n_e_pad, 128)


# ----------------------------------------------------------------------------
# Jitted forward wrapper (all glue stays inside jit)
# ----------------------------------------------------------------------------
@jax.jit
def gcn_net_forward(params, drug_x, drug_adj, xd, xm, adj_gat, adj_tf,
                    edge_index_test):
    n_drugs, n_atoms, feat = drug_x.shape
    n_nodes = adj_gat.shape[0]
    hidden = params["conv3_w"].shape[1]
    out_channels = params["tf2"]["wq"].shape[1] // 2

    gat_heads, gat_dim = params["gat_asrc"].shape[0], hidden
    tf1_heads, tf1_dim = 4, hidden
    tf2_heads, tf2_dim = 2, out_channels

    # batched drug graphs: flatten nodes + block-diagonal normalized adjacency
    drug_x_flat = drug_x.reshape(n_drugs * n_atoms, feat)
    drug_adj_bd = jnp.zeros((n_drugs * n_atoms, n_drugs * n_atoms), jnp.float32)
    for i in range(n_drugs):
        drug_adj_bd = drug_adj_bd.at[i * n_atoms:(i + 1) * n_atoms,
                                     i * n_atoms:(i + 1) * n_atoms].set(drug_adj[i])
    mean_mat = jnp.kron(jnp.eye(n_drugs, dtype=jnp.float32),
                        jnp.ones((1, n_atoms), jnp.float32) / n_atoms)

    # block-diagonal GAT attention matrix: columns [a_src_h, a_dst_h] per head
    gat_att = jnp.zeros((gat_heads * gat_dim, 2 * gat_heads), jnp.float32)
    for h in range(gat_heads):
        gat_att = gat_att.at[h * gat_dim:(h + 1) * gat_dim, 2 * h].set(
            params["gat_asrc"][h])
        gat_att = gat_att.at[h * gat_dim:(h + 1) * gat_dim, 2 * h + 1].set(
            params["gat_adst"][h])

    # merged q|k|v|skip projections
    def merge_tf(p):
        w = jnp.concatenate([p["wq"], p["wk"], p["wv"], p["wsk"]], axis=1)
        b = jnp.concatenate([p["bq"], p["bk"], p["bv"], p["bsk"]], axis=1)
        return w, b

    tf1_w, tf1_b = merge_tf(params["tf1"])
    tf2_w, tf2_b = merge_tf(params["tf2"])

    # one-hot gather matrices for edge scores (padded to 8 rows)
    n_e = edge_index_test.shape[1]
    n_e_pad = max(8, ((n_e + 7) // 8) * 8)
    sel_a = jnp.zeros((n_e_pad, n_nodes), jnp.float32).at[:n_e].set(
        jax.nn.one_hot(edge_index_test[0], n_nodes, dtype=jnp.float32))
    sel_b = jnp.zeros((n_e_pad, n_nodes), jnp.float32).at[:n_e].set(
        jax.nn.one_hot(edge_index_test[1], n_nodes, dtype=jnp.float32))

    kernel = functools.partial(
        _fused_forward_kernel,
        gat_heads=gat_heads, gat_dim=gat_dim,
        tf1_heads=tf1_heads, tf1_dim=tf1_dim,
        tf2_heads=tf2_heads, tf2_dim=tf2_dim)

    out = pl.pallas_call(
        kernel,
        out_shape=jax.ShapeDtypeStruct((n_e_pad, 128), jnp.float32),
        in_specs=[VMEM] * 22,
        out_specs=VMEM,
    )(drug_x_flat, drug_adj_bd, mean_mat, params["conv3_w"], params["conv3_b"],
      xd, xm, params["mlp1_w"], params["mlp1_b"], params["mlp2_w"], params["mlp2_b"],
      params["gat_w"], gat_att, params["gat_b"], adj_gat,
      tf1_w, tf1_b, tf2_w, tf2_b, adj_tf,
      sel_a, sel_b)

    # TODO(synk): np.savetxt('scores.txt', ...) side effect (and undefined
    # `scoress` in the reference) intentionally not reproduced.
    return out[:n_e, 0]


# ----------------------------------------------------------------------------
# Glue: dense adjacency construction (matches PyG message-passing semantics)
# ----------------------------------------------------------------------------
def dense_adj(edge_index, num_nodes, add_self_loops):
    src, dst = edge_index[0], edge_index[1]
    adj = jnp.zeros((num_nodes, num_nodes), jnp.float32).at[dst, src].set(1.0)
    if add_self_loops:
        idx = jnp.arange(num_nodes)
        adj = adj.at[idx, idx].set(1.0)
    return adj  # adj[i, j] = 1 iff message j -> i


def gcn_norm_adj(edge_index, num_nodes):
    src, dst = edge_index[0], edge_index[1]
    loop = jnp.arange(num_nodes)
    src = jnp.concatenate([src, loop])
    dst = jnp.concatenate([dst, loop])
    a = jnp.zeros((num_nodes, num_nodes), jnp.float32).at[dst, src].add(1.0)
    deg = jnp.sum(a, axis=1)
    dis = jnp.where(deg > 0, 1.0 / jnp.sqrt(deg), 0.0)
    return dis[:, None] * a * dis[None, :]


# ----------------------------------------------------------------------------
# Deterministic parameter / input construction
# ----------------------------------------------------------------------------
def init_params(key, in_d, in_m, hidden, out_ch):
    keys = iter(jax.random.split(key, 40))

    def mat(shape, fan_in):
        return jax.random.normal(next(keys), shape, jnp.float32) / math.sqrt(fan_in)

    def tf_block(f_in, heads, head_dim):
        f_out = heads * head_dim
        return {
            "wq": mat((f_in, f_out), f_in), "bq": mat((1, f_out), f_in),
            "wk": mat((f_in, f_out), f_in), "bk": mat((1, f_out), f_in),
            "wv": mat((f_in, f_out), f_in), "bv": mat((1, f_out), f_in),
            "wsk": mat((f_in, f_out), f_in), "bsk": mat((1, f_out), f_in),
        }

    return {
        "conv3_w": mat((58, hidden), 58), "conv3_b": mat((1, hidden), 58),
        "mlp1_w": mat((in_d, hidden), in_d), "mlp1_b": mat((1, hidden), in_d),
        "mlp2_w": mat((in_m, hidden), in_m), "mlp2_b": mat((1, hidden), in_m),
        "gat_w": mat((hidden, 4 * hidden), hidden),
        "gat_asrc": mat((4, hidden), hidden),
        "gat_adst": mat((4, hidden), hidden),
        "gat_b": mat((1, 4 * hidden), hidden),
        "tf1": tf_block(4 * hidden, 4, hidden),
        "tf2": tf_block(4 * hidden, 2, out_ch),
    }


if __name__ == "__main__":
    in_channelsD, in_channelsM = 16, 24
    hidden_channels, out_channels = 32, 16
    n_drugs, n_m = 4, 4
    n_nodes = n_drugs + n_m
    n_atoms = 8

    key = jax.random.PRNGKey(0)
    k_par, k_xd, k_xm, k_drug = jax.random.split(key, 4)

    params = init_params(k_par, in_channelsD, in_channelsM,
                         hidden_channels, out_channels)

    # inputs
    xd = jax.random.normal(k_xd, (n_drugs, in_channelsD), jnp.float32)
    xm = jax.random.normal(k_xm, (n_m, in_channelsM), jnp.float32)

    # drug_smiles: 4 ring-shaped molecular graphs, 8 atoms, 58-dim features
    drug_x = jax.random.normal(k_drug, (n_drugs, n_atoms, 58), jnp.float32)
    ring_src = jnp.arange(n_atoms)
    ring_dst = (ring_src + 1) % n_atoms
    drug_edge_index = jnp.stack([jnp.concatenate([ring_src, ring_dst]),
                                 jnp.concatenate([ring_dst, ring_src])])
    drug_adj = jnp.stack([gcn_norm_adj(drug_edge_index, n_atoms)] * n_drugs)

    # combined drug+m graph edges (symmetric); every node has at least one in-edge
    e_src = jnp.array([0, 1, 2, 3, 0, 2, 4, 6], jnp.int32)
    e_dst = jnp.array([4, 5, 6, 7, 1, 3, 5, 7], jnp.int32)
    edge_index = jnp.stack([jnp.concatenate([e_src, e_dst]),
                            jnp.concatenate([e_dst, e_src])])
    edge_index_test = jnp.array([[0, 1, 2, 3, 0, 2],
                                 [4, 5, 6, 7, 5, 7]], jnp.int32)

    adj_gat = dense_adj(edge_index, n_nodes, add_self_loops=True)   # GATConv adds self loops
    adj_tf = dense_adj(edge_index, n_nodes, add_self_loops=False)   # TransformerConv does not

    scores = gcn_net_forward(params, drug_x, drug_adj, xd, xm,
                             adj_gat, adj_tf, edge_index_test)
    jax.block_until_ready(scores)
    assert scores.shape == (edge_index_test.shape[1],)
    print("KERNEL_OK")
</pallas_src>

<mosaic_0001>
module attributes {stable_mosaic.version = 11 : i64} {
  func.func @_fused_forward_kernel(%arg0: memref<32x58xf32, #tpu.memory_space<vmem>>, %arg1: memref<32x32xf32, #tpu.memory_space<vmem>>, %arg2: memref<4x32xf32, #tpu.memory_space<vmem>>, %arg3: memref<58x32xf32, #tpu.memory_space<vmem>>, %arg4: memref<1x32xf32, #tpu.memory_space<vmem>>, %arg5: memref<4x16xf32, #tpu.memory_space<vmem>>, %arg6: memref<4x24xf32, #tpu.memory_space<vmem>>, %arg7: memref<16x32xf32, #tpu.memory_space<vmem>>, %arg8: memref<1x32xf32, #tpu.memory_space<vmem>>, %arg9: memref<24x32xf32, #tpu.memory_space<vmem>>, %arg10: memref<1x32xf32, #tpu.memory_space<vmem>>, %arg11: memref<32x128xf32, #tpu.memory_space<vmem>>, %arg12: memref<128x8xf32, #tpu.memory_space<vmem>>, %arg13: memref<1x128xf32, #tpu.memory_space<vmem>>, %arg14: memref<8x8xf32, #tpu.memory_space<vmem>>, %arg15: memref<128x512xf32, #tpu.memory_space<vmem>>, %arg16: memref<1x512xf32, #tpu.memory_space<vmem>>, %arg17: memref<128x128xf32, #tpu.memory_space<vmem>>, %arg18: memref<1x128xf32, #tpu.memory_space<vmem>>, %arg19: memref<8x8xf32, #tpu.memory_space<vmem>>, %arg20: memref<8x8xf32, #tpu.memory_space<vmem>>, %arg21: memref<8x8xf32, #tpu.memory_space<vmem>>, %arg22: memref<8x128xf32, #tpu.memory_space<vmem>>) attributes {dimension_semantics = [], scalar_prefetch = 0 : i64, scratch_operands = 0 : i64, tpu.core_type = #tpu.core_type<tc>} {
    %c0 = arith.constant 0 : index
    %c0_0 = arith.constant 0 : index
    %0 = vector.load %arg0[%c0, %c0_0] : memref<32x58xf32, #tpu.memory_space<vmem>>, vector<32x58xf32>
    %c0_1 = arith.constant 0 : index
    %c0_2 = arith.constant 0 : index
    %1 = vector.load %arg3[%c0_1, %c0_2] : memref<58x32xf32, #tpu.memory_space<vmem>>, vector<58x32xf32>
    %cst = arith.constant dense<0.000000e+00> : vector<32x32xf32>
    %2 = tpu.matmul %0, %1, %cst {dimension_numbers = #tpu.dot_dimension_numbers<[1], [0], [0], [1], [0, 0, 1, 1], [], []>} : vector<32x58xf32>, vector<58x32xf32>, vector<32x32xf32> -> vector<32x32xf32>
    %c0_3 = arith.constant 0 : index
    %c0_4 = arith.constant 0 : index
    %3 = vector.load %arg1[%c0_3, %c0_4] : memref<32x32xf32, #tpu.memory_space<vmem>>, vector<32x32xf32>
    %cst_5 = arith.constant dense<0.000000e+00> : vector<32x32xf32>
    %4 = tpu.matmul %3, %2, %cst_5 {dimension_numbers = #tpu.dot_dimension_numbers<[1], [0], [0], [1], [0, 0, 1, 1], [], []>} : vector<32x32xf32>, vector<32x32xf32>, vector<32x32xf32> -> vector<32x32xf32>
    %c0_6 = arith.constant 0 : index
    %c0_7 = arith.constant 0 : index
    %5 = vector.load %arg4[%c0_6, %c0_7] : memref<1x32xf32, #tpu.memory_space<vmem>>, vector<1x32xf32>
    %6 = vector.broadcast %5 : vector<1x32xf32> to vector<32x32xf32>
    %7 = arith.addf %4, %6 : vector<32x32xf32>
    %cst_8 = arith.constant 0.000000e+00 : f32
    %8 = vector.broadcast %cst_8 : f32 to vector<32x32xf32>
    %9 = arith.maximumf %7, %8 : vector<32x32xf32>
    %c0_9 = arith.constant 0 : index
    %c0_10 = arith.constant 0 : index
    %10 = vector.load %arg2[%c0_9, %c0_10] : memref<4x32xf32, #tpu.memory_space<vmem>>, vector<4x32xf32>
    %cst_11 = arith.constant dense<0.000000e+00> : vector<4x32xf32>
    %11 = tpu.matmul %10, %9, %cst_11 {dimension_numbers = #tpu.dot_dimension_numbers<[1], [0], [0], [1], [0, 0, 1, 1], [], []>} : vector<4x32xf32>, vector<32x32xf32>, vector<4x32xf32> -> vector<4x32xf32>
    %c0_12 = arith.constant 0 : index
    %c0_13 = arith.constant 0 : index
    %12 = vector.load %arg5[%c0_12, %c0_13] : memref<4x16xf32, #tpu.memory_space<vmem>>, vector<4x16xf32>
    %c0_14 = arith.constant 0 : index
    %c0_15 = arith.constant 0 : index
    %13 = vector.load %arg7[%c0_14, %c0_15] : memref<16x32xf32, #tpu.memory_space<vmem>>, vector<16x32xf32>
    %cst_16 = arith.constant dense<0.000000e+00> : vector<4x32xf32>
    %14 = tpu.matmul %12, %13, %cst_16 {dimension_numbers = #tpu.dot_dimension_numbers<[1], [0], [0], [1], [0, 0, 1, 1], [], []>} : vector<4x16xf32>, vector<16x32xf32>, vector<4x32xf32> -> vector<4x32xf32>
    %c0_17 = arith.constant 0 : index
    %c0_18 = arith.constant 0 : index
    %15 = vector.load %arg8[%c0_17, %c0_18] : memref<1x32xf32, #tpu.memory_space<vmem>>, vector<1x32xf32>
    %16 = vector.broadcast %15 : vector<1x32xf32> to vector<4x32xf32>
    %17 = arith.addf %14, %16 : vector<4x32xf32>
    %cst_19 = arith.constant 0.000000e+00 : f32
    %18 = vector.broadcast %cst_19 : f32 to vector<4x32xf32>
    %19 = arith.maximumf %17, %18 : vector<4x32xf32>
    %20 = arith.addf %19, %11 : vector<4x32xf32>
    %cst_20 = arith.constant 5.000000e-01 : f32
    %21 = vector.broadcast %cst_20 : f32 to vector<4x32xf32>
    %22 = arith.mulf %20, %21 : vector<4x32xf32>
    %c0_21 = arith.constant 0 : index
    %c0_22 = arith.constant 0 : index
    %23 = vector.load %arg6[%c0_21, %c0_22] : memref<4x24xf32, #tpu.memory_space<vmem>>, vector<4x24xf32>
    %c0_23 = arith.constant 0 : index
    %c0_24 = arith.constant 0 : index
    %24 = vector.load %arg9[%c0_23, %c0_24] : memref<24x32xf32, #tpu.memory_space<vmem>>, vector<24x32xf32>
    %cst_25 = arith.constant dense<0.000000e+00> : vector<4x32xf32>
    %25 = tpu.matmul %23, %24, %cst_25 {dimension_numbers = #tpu.dot_dimension_numbers<[1], [0], [0], [1], [0, 0, 1, 1], [], []>} : vector<4x24xf32>, vector<24x32xf32>, vector<4x32xf32> -> vector<4x32xf32>
    %c0_26 = arith.constant 0 : index
    %c0_27 = arith.constant 0 : index
    %26 = vector.load %arg10[%c0_26, %c0_27] : memref<1x32xf32, #tpu.memory_space<vmem>>, vector<1x32xf32>
    %27 = vector.broadcast %26 : vector<1x32xf32> to vector<4x32xf32>
    %28 = arith.addf %25, %27 : vector<4x32xf32>
    %cst_28 = arith.constant 0.000000e+00 : f32
    %29 = vector.broadcast %cst_28 : f32 to vector<4x32xf32>
    %30 = arith.maximumf %28, %29 : vector<4x32xf32>
    %31 = tpu.concatenate %22, %30 in 0 : vector<4x32xf32>, vector<4x32xf32> -> vector<8x32xf32>
    %c0_29 = arith.constant 0 : index
    %c0_30 = arith.constant 0 : index
    %32 = vector.load %arg11[%c0_29, %c0_30] : memref<32x128xf32, #tpu.memory_space<vmem>>, vector<32x128xf32>
    %cst_31 = arith.constant dense<0.000000e+00> : vector<8x128xf32>
    %33 = tpu.matmul %31, %32, %cst_31 {dimension_numbers = #tpu.dot_dimension_numbers<[1], [0], [0], [1], [0, 0, 1, 1], [], []>} : vector<8x32xf32>, vector<32x128xf32>, vector<8x128xf32> -> vector<8x128xf32>
    %c0_32 = arith.constant 0 : index
    %c0_33 = arith.constant 0 : index
    %34 = vector.load %arg12[%c0_32, %c0_33] : memref<128x8xf32, #tpu.memory_space<vmem>>, vector<128x8xf32>
    %cst_34 = arith.constant dense<0.000000e+00> : vector<8x8xf32>
    %35 = tpu.matmul %33, %34, %cst_34 {dimension_numbers = #tpu.dot_dimension_numbers<[1], [0], [0], [1], [0, 0, 1, 1], [], []>} : vector<8x128xf32>, vector<128x8xf32>, vector<8x8xf32> -> vector<8x8xf32>
    %36 = tpu.transpose %35, [1, 0] : vector<8x8xf32> -> vector<8x8xf32>
    %c0_35 = arith.constant 0 : index
    %c0_36 = arith.constant 0 : index
    %37 = vector.load %arg14[%c0_35, %c0_36] : memref<8x8xf32, #tpu.memory_space<vmem>>, vector<8x8xf32>
    %cst_37 = arith.constant 0.000000e+00 : f32
    %38 = vector.broadcast %cst_37 : f32 to vector<8x8xf32>
    %39 = arith.cmpf ogt, %37, %38 : vector<8x8xf32>
    %40 = vector.extract_strided_slice %33 {offsets = [0, 0], sizes = [8, 32], strides = [1, 1]} : vector<8x128xf32> to vector<8x32xf32>
    %41 = vector.extract_strided_slice %36 {offsets = [0, 0], sizes = [1, 8], strides = [1, 1]} : vector<8x8xf32> to vector<1x8xf32>
    %42 = vector.extract_strided_slice %35 {offsets = [0, 1], sizes = [8, 1], strides = [1, 1]} : vector<8x8xf32> to vector<8x1xf32>
    %43 = vector.broadcast %42 : vector<8x1xf32> to vector<8x8xf32>
    %44 = vector.broadcast %41 : vector<1x8xf32> to vector<8x8xf32>
    %45 = arith.addf %43, %44 : vector<8x8xf32>
    %cst_38 = arith.constant 0.000000e+00 : f32
    %46 = vector.broadcast %cst_38 : f32 to vector<8x8xf32>
    %47 = arith.cmpf ogt, %45, %46 : vector<8x8xf32>
    %cst_39 = arith.constant 2.000000e-01 : f32
    %48 = vector.broadcast %cst_39 : f32 to vector<8x8xf32>
    %49 = arith.mulf %48, %45 : vector<8x8xf32>
    %50 = arith.select %47, %45, %49 : vector<8x8xi1>, vector<8x8xf32>
    %cst_40 = arith.constant -1.000000e+30 : f32
    %51 = vector.broadcast %cst_40 : f32 to vector<8x8xf32>
    %52 = arith.select %39, %50, %51 : vector<8x8xi1>, vector<8x8xf32>
    %cst_41 = arith.constant dense<0xFF800000> : vector<8xf32>
    %53 = vector.multi_reduction <maximumf>, %52, %cst_41 [1] : vector<8x8xf32> to vector<8xf32>
    %54 = vector.shape_cast %53 : vector<8xf32> to vector<8x1xf32>
    %55 = vector.broadcast %54 : vector<8x1xf32> to vector<8x8xf32>
    %56 = arith.subf %52, %55 : vector<8x8xf32>
    %57 = math.exp %56 : vector<8x8xf32>
    %cst_42 = arith.constant 0.000000e+00 : f32
    %58 = vector.broadcast %cst_42 : f32 to vector<8x8xf32>
    %59 = arith.select %39, %57, %58 : vector<8x8xi1>, vector<8x8xf32>
    %cst_43 = arith.constant dense<0.000000e+00> : vector<8xf32>
    %60 = vector.multi_reduction <add>, %59, %cst_43 [1] : vector<8x8xf32> to vector<8xf32>
    %61 = vector.shape_cast %60 : vector<8xf32> to vector<8x1xf32>
    %cst_44 = arith.constant 1.000000e-16 : f32
    %62 = vector.broadcast %cst_44 : f32 to vector<8x1xf32>
    %63 = arith.maximumf %61, %62 : vector<8x1xf32>
    %64 = tpu.reciprocal %63 {approx = true} : vector<8x1xf32> -> vector<8x1xf32>
    %65 = vector.broadcast %64 : vector<8x1xf32> to vector<8x8xf32>
    %66 = arith.mulf %59, %65 : vector<8x8xf32>
    %cst_45 = arith.constant dense<0.000000e+00> : vector<8x32xf32>
    %67 = tpu.matmul %66, %40, %cst_45 {dimension_numbers = #tpu.dot_dimension_numbers<[1], [0], [0], [1], [0, 0, 1, 1], [], []>} : vector<8x8xf32>, vector<8x32xf32>, vector<8x32xf32> -> vector<8x32xf32>
    %68 = vector.extract_strided_slice %33 {offsets = [0, 32], sizes = [8, 32], strides = [1, 1]} : vector<8x128xf32> to vector<8x32xf32>
    %69 = vector.extract_strided_slice %36 {offsets = [2, 0], sizes = [1, 8], strides = [1, 1]} : vector<8x8xf32> to vector<1x8xf32>
    %70 = vector.extract_strided_slice %35 {offsets = [0, 3], sizes = [8, 1], strides = [1, 1]} : vector<8x8xf32> to vector<8x1xf32>
    %71 = vector.broadcast %70 : vector<8x1xf32> to vector<8x8xf32>
    %72 = vector.broadcast %69 : vector<1x8xf32> to vector<8x8xf32>
    %73 = arith.addf %71, %72 : vector<8x8xf32>
    %cst_46 = arith.constant 0.000000e+00 : f32
    %74 = vector.broadcast %cst_46 : f32 to vector<8x8xf32>
    %75 = arith.cmpf ogt, %73, %74 : vector<8x8xf32>
    %cst_47 = arith.constant 2.000000e-01 : f32
    %76 = vector.broadcast %cst_47 : f32 to vector<8x8xf32>
    %77 = arith.mulf %76, %73 : vector<8x8xf32>
    %78 = arith.select %75, %73, %77 : vector<8x8xi1>, vector<8x8xf32>
    %cst_48 = arith.constant -1.000000e+30 : f32
    %79 = vector.broadcast %cst_48 : f32 to vector<8x8xf32>
    %80 = arith.select %39, %78, %79 : vector<8x8xi1>, vector<8x8xf32>
    %cst_49 = arith.constant dense<0xFF800000> : vector<8xf32>
    %81 = vector.multi_reduction <maximumf>, %80, %cst_49 [1] : vector<8x8xf32> to vector<8xf32>
    %82 = vector.shape_cast %81 : vector<8xf32> to vector<8x1xf32>
    %83 = vector.broadcast %82 : vector<8x1xf32> to vector<8x8xf32>
    %84 = arith.subf %80, %83 : vector<8x8xf32>
    %85 = math.exp %84 : vector<8x8xf32>
    %cst_50 = arith.constant 0.000000e+00 : f32
    %86 = vector.broadcast %cst_50 : f32 to vector<8x8xf32>
    %87 = arith.select %39, %85, %86 : vector<8x8xi1>, vector<8x8xf32>
    %cst_51 = arith.constant dense<0.000000e+00> : vector<8xf32>
    %88 = vector.multi_reduction <add>, %87, %cst_51 [1] : vector<8x8xf32> to vector<8xf32>
    %89 = vector.shape_cast %88 : vector<8xf32> to vector<8x1xf32>
    %cst_52 = arith.constant 1.000000e-16 : f32
    %90 = vector.broadcast %cst_52 : f32 to vector<8x1xf32>
    %91 = arith.maximumf %89, %90 : vector<8x1xf32>
    %92 = tpu.reciprocal %91 {approx = true} : vector<8x1xf32> -> vector<8x1xf32>
    %93 = vector.broadcast %92 : vector<8x1xf32> to vector<8x8xf32>
    %94 = arith.mulf %87, %93 : vector<8x8xf32>
    %cst_53 = arith.constant dense<0.000000e+00> : vector<8x32xf32>
    %95 = tpu.matmul %94, %68, %cst_53 {dimension_numbers = #tpu.dot_dimension_numbers<[1], [0], [0], [1], [0, 0, 1, 1], [], []>} : vector<8x8xf32>, vector<8x32xf32>, vector<8x32xf32> -> vector<8x32xf32>
    %96 = vector.extract_strided_slice %33 {offsets = [0, 64], sizes = [8, 32], strides = [1, 1]} : vector<8x128xf32> to vector<8x32xf32>
    %97 = vector.extract_strided_slice %36 {offsets = [4, 0], sizes = [1, 8], strides = [1, 1]} : vector<8x8xf32> to vector<1x8xf32>
    %98 = vector.extract_strided_slice %35 {offsets = [0, 5], sizes = [8, 1], strides = [1, 1]} : vector<8x8xf32> to vector<8x1xf32>
    %99 = vector.broadcast %98 : vector<8x1xf32> to vector<8x8xf32>
    %100 = vector.broadcast %97 : vector<1x8xf32> to vector<8x8xf32>
    %101 = arith.addf %99, %100 : vector<8x8xf32>
    %cst_54 = arith.constant 0.000000e+00 : f32
    %102 = vector.broadcast %cst_54 : f32 to vector<8x8xf32>
    %103 = arith.cmpf ogt, %101, %102 : vector<8x8xf32>
    %cst_55 = arith.constant 2.000000e-01 : f32
    %104 = vector.broadcast %cst_55 : f32 to vector<8x8xf32>
    %105 = arith.mulf %104, %101 : vector<8x8xf32>
    %106 = arith.select %103, %101, %105 : vector<8x8xi1>, vector<8x8xf32>
    %cst_56 = arith.constant -1.000000e+30 : f32
    %107 = vector.broadcast %cst_56 : f32 to vector<8x8xf32>
    %108 = arith.select %39, %106, %107 : vector<8x8xi1>, vector<8x8xf32>
    %cst_57 = arith.constant dense<0xFF800000> : vector<8xf32>
    %109 = vector.multi_reduction <maximumf>, %108, %cst_57 [1] : vector<8x8xf32> to vector<8xf32>
    %110 = vector.shape_cast %109 : vector<8xf32> to vector<8x1xf32>
    %111 = vector.broadcast %110 : vector<8x1xf32> to vector<8x8xf32>
    %112 = arith.subf %108, %111 : vector<8x8xf32>
    %113 = math.exp %112 : vector<8x8xf32>
    %cst_58 = arith.constant 0.000000e+00 : f32
    %114 = vector.broadcast %cst_58 : f32 to vector<8x8xf32>
    %115 = arith.select %39, %113, %114 : vector<8x8xi1>, vector<8x8xf32>
    %cst_59 = arith.constant dense<0.000000e+00> : vector<8xf32>
    %116 = vector.multi_reduction <add>, %115, %cst_59 [1] : vector<8x8xf32> to vector<8xf32>
    %117 = vector.shape_cast %116 : vector<8xf32> to vector<8x1xf32>
    %cst_60 = arith.constant 1.000000e-16 : f32
    %118 = vector.broadcast %cst_60 : f32 to vector<8x1xf32>
    %119 = arith.maximumf %117, %118 : vector<8x1xf32>
    %120 = tpu.reciprocal %119 {approx = true} : vector<8x1xf32> -> vector<8x1xf32>
    %121 = vector.broadcast %120 : vector<8x1xf32> to vector<8x8xf32>
    %122 = arith.mulf %115, %121 : vector<8x8xf32>
    %cst_61 = arith.constant dense<0.000000e+00> : vector<8x32xf32>
    %123 = tpu.matmul %122, %96, %cst_61 {dimension_numbers = #tpu.dot_dimension_numbers<[1], [0], [0], [1], [0, 0, 1, 1], [], []>} : vector<8x8xf32>, vector<8x32xf32>, vector<8x32xf32> -> vector<8x32xf32>
    %124 = vector.extract_strided_slice %33 {offsets = [0, 96], sizes = [8, 32], strides = [1, 1]} : vector<8x128xf32> to vector<8x32xf32>
    %125 = vector.extract_strided_slice %36 {offsets = [6, 0], sizes = [1, 8], strides = [1, 1]} : vector<8x8xf32> to vector<1x8xf32>
    %126 = vector.extract_strided_slice %35 {offsets = [0, 7], sizes = [8, 1], strides = [1, 1]} : vector<8x8xf32> to vector<8x1xf32>
    %127 = vector.broadcast %126 : vector<8x1xf32> to vector<8x8xf32>
    %128 = vector.broadcast %125 : vector<1x8xf32> to vector<8x8xf32>
    %129 = arith.addf %127, %128 : vector<8x8xf32>
    %cst_62 = arith.constant 0.000000e+00 : f32
    %130 = vector.broadcast %cst_62 : f32 to vector<8x8xf32>
    %131 = arith.cmpf ogt, %129, %130 : vector<8x8xf32>
    %cst_63 = arith.constant 2.000000e-01 : f32
    %132 = vector.broadcast %cst_63 : f32 to vector<8x8xf32>
    %133 = arith.mulf %132, %129 : vector<8x8xf32>
    %134 = arith.select %131, %129, %133 : vector<8x8xi1>, vector<8x8xf32>
    %cst_64 = arith.constant -1.000000e+30 : f32
    %135 = vector.broadcast %cst_64 : f32 to vector<8x8xf32>
    %136 = arith.select %39, %134, %135 : vector<8x8xi1>, vector<8x8xf32>
    %cst_65 = arith.constant dense<0xFF800000> : vector<8xf32>
    %137 = vector.multi_reduction <maximumf>, %136, %cst_65 [1] : vector<8x8xf32> to vector<8xf32>
    %138 = vector.shape_cast %137 : vector<8xf32> to vector<8x1xf32>
    %139 = vector.broadcast %138 : vector<8x1xf32> to vector<8x8xf32>
    %140 = arith.subf %136, %139 : vector<8x8xf32>
    %141 = math.exp %140 : vector<8x8xf32>
    %cst_66 = arith.constant 0.000000e+00 : f32
    %142 = vector.broadcast %cst_66 : f32 to vector<8x8xf32>
    %143 = arith.select %39, %141, %142 : vector<8x8xi1>, vector<8x8xf32>
    %cst_67 = arith.constant dense<0.000000e+00> : vector<8xf32>
    %144 = vector.multi_reduction <add>, %143, %cst_67 [1] : vector<8x8xf32> to vector<8xf32>
    %145 = vector.shape_cast %144 : vector<8xf32> to vector<8x1xf32>
    %cst_68 = arith.constant 1.000000e-16 : f32
    %146 = vector.broadcast %cst_68 : f32 to vector<8x1xf32>
    %147 = arith.maximumf %145, %146 : vector<8x1xf32>
    %148 = tpu.reciprocal %147 {approx = true} : vector<8x1xf32> -> vector<8x1xf32>
    %149 = vector.broadcast %148 : vector<8x1xf32> to vector<8x8xf32>
    %150 = arith.mulf %143, %149 : vector<8x8xf32>
    %cst_69 = arith.constant dense<0.000000e+00> : vector<8x32xf32>
    %151 = tpu.matmul %150, %124, %cst_69 {dimension_numbers = #tpu.dot_dimension_numbers<[1], [0], [0], [1], [0, 0, 1, 1], [], []>} : vector<8x8xf32>, vector<8x32xf32>, vector<8x32xf32> -> vector<8x32xf32>
    %152 = tpu.concatenate %67, %95, %123, %151 in 1 : vector<8x32xf32>, vector<8x32xf32>, vector<8x32xf32>, vector<8x32xf32> -> vector<8x128xf32>
    %c0_70 = arith.constant 0 : index
    %c0_71 = arith.constant 0 : index
    %153 = vector.load %arg13[%c0_70, %c0_71] : memref<1x128xf32, #tpu.memory_space<vmem>>, vector<1x128xf32>
    %154 = vector.broadcast %153 : vector<1x128xf32> to vector<8x128xf32>
    %155 = arith.addf %152, %154 : vector<8x128xf32>
    %cst_72 = arith.constant 0.000000e+00 : f32
    %156 = vector.broadcast %cst_72 : f32 to vector<8x128xf32>
    %157 = arith.maximumf %155, %156 : vector<8x128xf32>
    %c0_73 = arith.constant 0 : index
    %c0_74 = arith.constant 0 : index
    %158 = vector.load %arg19[%c0_73, %c0_74] : memref<8x8xf32, #tpu.memory_space<vmem>>, vector<8x8xf32>
    %cst_75 = arith.constant 0.000000e+00 : f32
    %159 = vector.broadcast %cst_75 : f32 to vector<8x8xf32>
    %160 = arith.cmpf ogt, %158, %159 : vector<8x8xf32>
    %c0_76 = arith.constant 0 : index
    %c0_77 = arith.constant 0 : index
    %161 = vector.load %arg15[%c0_76, %c0_77] : memref<128x512xf32, #tpu.memory_space<vmem>>, vector<128x512xf32>
    %cst_78 = arith.constant dense<0.000000e+00> : vector<8x512xf32>
    %162 = tpu.matmul %157, %161, %cst_78 {dimension_numbers = #tpu.dot_dimension_numbers<[1], [0], [0], [1], [0, 0, 1, 1], [], []>} : vector<8x128xf32>, vector<128x512xf32>, vector<8x512xf32> -> vector<8x512xf32>
    %c0_79 = arith.constant 0 : index
    %c0_80 = arith.constant 0 : index
    %163 = vector.load %arg16[%c0_79, %c0_80] : memref<1x512xf32, #tpu.memory_space<vmem>>, vector<1x512xf32>
    %164 = vector.broadcast %163 : vector<1x512xf32> to vector<8x512xf32>
    %165 = arith.addf %162, %164 : vector<8x512xf32>
    %166 = vector.extract_strided_slice %165 {offsets = [0, 0], sizes = [8, 128], strides = [1, 1]} : vector<8x512xf32> to vector<8x128xf32>
    %167 = vector.extract_strided_slice %165 {offsets = [0, 128], sizes = [8, 128], strides = [1, 1]} : vector<8x512xf32> to vector<8x128xf32>
    %168 = vector.extract_strided_slice %165 {offsets = [0, 256], sizes = [8, 128], strides = [1, 1]} : vector<8x512xf32> to vector<8x128xf32>
    %169 = vector.extract_strided_slice %165 {offsets = [0, 384], sizes = [8, 128], strides = [1, 1]} : vector<8x512xf32> to vector<8x128xf32>
    %170 = vector.extract_strided_slice %166 {offsets = [0, 0], sizes = [8, 32], strides = [1, 1]} : vector<8x128xf32> to vector<8x32xf32>
    %171 = vector.extract_strided_slice %167 {offsets = [0, 0], sizes = [8, 32], strides = [1, 1]} : vector<8x128xf32> to vector<8x32xf32>
    %172 = vector.extract_strided_slice %168 {offsets = [0, 0], sizes = [8, 32], strides = [1, 1]} : vector<8x128xf32> to vector<8x32xf32>
    %cst_81 = arith.constant dense<0.000000e+00> : vector<8x8xf32>
    %173 = tpu.matmul %170, %171, %cst_81 {dimension_numbers = #tpu.dot_dimension_numbers<[1], [1], [0], [0], [0, 0, 1, 0], [], []>} : vector<8x32xf32>, vector<8x32xf32>, vector<8x8xf32> -> vector<8x8xf32>
    %cst_82 = arith.constant 0.176776692 : f32
    %174 = vector.broadcast %cst_82 : f32 to vector<8x8xf32>
    %175 = arith.mulf %173, %174 : vector<8x8xf32>
    %cst_83 = arith.constant -1.000000e+30 : f32
    %176 = vector.broadcast %cst_83 : f32 to vector<8x8xf32>
    %177 = arith.select %160, %175, %176 : vector<8x8xi1>, vector<8x8xf32>
    %cst_84 = arith.constant dense<0xFF800000> : vector<8xf32>
    %178 = vector.multi_reduction <maximumf>, %177, %cst_84 [1] : vector<8x8xf32> to vector<8xf32>
    %179 = vector.shape_cast %178 : vector<8xf32> to vector<8x1xf32>
    %180 = vector.broadcast %179 : vector<8x1xf32> to vector<8x8xf32>
    %181 = arith.subf %177, %180 : vector<8x8xf32>
    %182 = math.exp %181 : vector<8x8xf32>
    %cst_85 = arith.constant 0.000000e+00 : f32
    %183 = vector.broadcast %cst_85 : f32 to vector<8x8xf32>
    %184 = arith.select %160, %182, %183 : vector<8x8xi1>, vector<8x8xf32>
    %cst_86 = arith.constant dense<0.000000e+00> : vector<8xf32>
    %185 = vector.multi_reduction <add>, %184, %cst_86 [1] : vector<8x8xf32> to vector<8xf32>
    %186 = vector.shape_cast %185 : vector<8xf32> to vector<8x1xf32>
    %cst_87 = arith.constant 1.000000e-16 : f32
    %187 = vector.broadcast %cst_87 : f32 to vector<8x1xf32>
    %188 = arith.maximumf %186, %187 : vector<8x1xf32>
    %189 = tpu.reciprocal %188 {approx = true} : vector<8x1xf32> -> vector<8x1xf32>
    %190 = vector.broadcast %189 : vector<8x1xf32> to vector<8x8xf32>
    %191 = arith.mulf %184, %190 : vector<8x8xf32>
    %cst_88 = arith.constant dense<0.000000e+00> : vector<8x32xf32>
    %192 = tpu.matmul %191, %172, %cst_88 {dimension_numbers = #tpu.dot_dimension_numbers<[1], [0], [0], [1], [0, 0, 1, 1], [], []>} : vector<8x8xf32>, vector<8x32xf32>, vector<8x32xf32> -> vector<8x32xf32>
    %193 = vector.extract_strided_slice %169 {offsets = [0, 0], sizes = [8, 32], strides = [1, 1]} : vector<8x128xf32> to vector<8x32xf32>
    %194 = arith.addf %192, %193 : vector<8x32xf32>
    %195 = vector.extract_strided_slice %166 {offsets = [0, 32], sizes = [8, 32], strides = [1, 1]} : vector<8x128xf32> to vector<8x32xf32>
    %196 = vector.extract_strided_slice %167 {offsets = [0, 32], sizes = [8, 32], strides = [1, 1]} : vector<8x128xf32> to vector<8x32xf32>
    %197 = vector.extract_strided_slice %168 {offsets = [0, 32], sizes = [8, 32], strides = [1, 1]} : vector<8x128xf32> to vector<8x32xf32>
    %cst_89 = arith.constant dense<0.000000e+00> : vector<8x8xf32>
    %198 = tpu.matmul %195, %196, %cst_89 {dimension_numbers = #tpu.dot_dimension_numbers<[1], [1], [0], [0], [0, 0, 1, 0], [], []>} : vector<8x32xf32>, vector<8x32xf32>, vector<8x8xf32> -> vector<8x8xf32>
    %cst_90 = arith.constant 0.176776692 : f32
    %199 = vector.broadcast %cst_90 : f32 to vector<8x8xf32>
    %200 = arith.mulf %198, %199 : vector<8x8xf32>
    %cst_91 = arith.constant -1.000000e+30 : f32
    %201 = vector.broadcast %cst_91 : f32 to vector<8x8xf32>
    %202 = arith.select %160, %200, %201 : vector<8x8xi1>, vector<8x8xf32>
    %cst_92 = arith.constant dense<0xFF800000> : vector<8xf32>
    %203 = vector.multi_reduction <maximumf>, %202, %cst_92 [1] : vector<8x8xf32> to vector<8xf32>
    %204 = vector.shape_cast %203 : vector<8xf32> to vector<8x1xf32>
    %205 = vector.broadcast %204 : vector<8x1xf32> to vector<8x8xf32>
    %206 = arith.subf %202, %205 : vector<8x8xf32>
    %207 = math.exp %206 : vector<8x8xf32>
    %cst_93 = arith.constant 0.000000e+00 : f32
    %208 = vector.broadcast %cst_93 : f32 to vector<8x8xf32>
    %209 = arith.select %160, %207, %208 : vector<8x8xi1>, vector<8x8xf32>
    %cst_94 = arith.constant dense<0.000000e+00> : vector<8xf32>
    %210 = vector.multi_reduction <add>, %209, %cst_94 [1] : vector<8x8xf32> to vector<8xf32>
    %211 = vector.shape_cast %210 : vector<8xf32> to vector<8x1xf32>
    %cst_95 = arith.constant 1.000000e-16 : f32
    %212 = vector.broadcast %cst_95 : f32 to vector<8x1xf32>
    %213 = arith.maximumf %211, %212 : vector<8x1xf32>
    %214 = tpu.reciprocal %213 {approx = true} : vector<8x1xf32> -> vector<8x1xf32>
    %215 = vector.broadcast %214 : vector<8x1xf32> to vector<8x8xf32>
    %216 = arith.mulf %209, %215 : vector<8x8xf32>
    %cst_96 = arith.constant dense<0.000000e+00> : vector<8x32xf32>
    %217 = tpu.matmul %216, %197, %cst_96 {dimension_numbers = #tpu.dot_dimension_numbers<[1], [0], [0], [1], [0, 0, 1, 1], [], []>} : vector<8x8xf32>, vector<8x32xf32>, vector<8x32xf32> -> vector<8x32xf32>
    %218 = vector.extract_strided_slice %169 {offsets = [0, 32], sizes = [8, 32], strides = [1, 1]} : vector<8x128xf32> to vector<8x32xf32>
    %219 = arith.addf %217, %218 : vector<8x32xf32>
    %220 = vector.extract_strided_slice %166 {offsets = [0, 64], sizes = [8, 32], strides = [1, 1]} : vector<8x128xf32> to vector<8x32xf32>
    %221 = vector.extract_strided_slice %167 {offsets = [0, 64], sizes = [8, 32], strides = [1, 1]} : vector<8x128xf32> to vector<8x32xf32>
    %222 = vector.extract_strided_slice %168 {offsets = [0, 64], sizes = [8, 32], strides = [1, 1]} : vector<8x128xf32> to vector<8x32xf32>
    %cst_97 = arith.constant dense<0.000000e+00> : vector<8x8xf32>
    %223 = tpu.matmul %220, %221, %cst_97 {dimension_numbers = #tpu.dot_dimension_numbers<[1], [1], [0], [0], [0, 0, 1, 0], [], []>} : vector<8x32xf32>, vector<8x32xf32>, vector<8x8xf32> -> vector<8x8xf32>
    %cst_98 = arith.constant 0.176776692 : f32
    %224 = vector.broadcast %cst_98 : f32 to vector<8x8xf32>
    %225 = arith.mulf %223, %224 : vector<8x8xf32>
    %cst_99 = arith.constant -1.000000e+30 : f32
    %226 = vector.broadcast %cst_99 : f32 to vector<8x8xf32>
    %227 = arith.select %160, %225, %226 : vector<8x8xi1>, vector<8x8xf32>
    %cst_100 = arith.constant dense<0xFF800000> : vector<8xf32>
    %228 = vector.multi_reduction <maximumf>, %227, %cst_100 [1] : vector<8x8xf32> to vector<8xf32>
    %229 = vector.shape_cast %228 : vector<8xf32> to vector<8x1xf32>
    %230 = vector.broadcast %229 : vector<8x1xf32> to vector<8x8xf32>
    %231 = arith.subf %227, %230 : vector<8x8xf32>
    %232 = math.exp %231 : vector<8x8xf32>
    %cst_101 = arith.constant 0.000000e+00 : f32
    %233 = vector.broadcast %cst_101 : f32 to vector<8x8xf32>
    %234 = arith.select %160, %232, %233 : vector<8x8xi1>, vector<8x8xf32>
    %cst_102 = arith.constant dense<0.000000e+00> : vector<8xf32>
    %235 = vector.multi_reduction <add>, %234, %cst_102 [1] : vector<8x8xf32> to vector<8xf32>
    %236 = vector.shape_cast %235 : vector<8xf32> to vector<8x1xf32>
    %cst_103 = arith.constant 1.000000e-16 : f32
    %237 = vector.broadcast %cst_103 : f32 to vector<8x1xf32>
    %238 = arith.maximumf %236, %237 : vector<8x1xf32>
    %239 = tpu.reciprocal %238 {approx = true} : vector<8x1xf32> -> vector<8x1xf32>
    %240 = vector.broadcast %239 : vector<8x1xf32> to vector<8x8xf32>
    %241 = arith.mulf %234, %240 : vector<8x8xf32>
    %cst_104 = arith.constant dense<0.000000e+00> : vector<8x32xf32>
    %242 = tpu.matmul %241, %222, %cst_104 {dimension_numbers = #tpu.dot_dimension_numbers<[1], [0], [0], [1], [0, 0, 1, 1], [], []>} : vector<8x8xf32>, vector<8x32xf32>, vector<8x32xf32> -> vector<8x32xf32>
    %243 = vector.extract_strided_slice %169 {offsets = [0, 64], sizes = [8, 32], strides = [1, 1]} : vector<8x128xf32> to vector<8x32xf32>
    %244 = arith.addf %242, %243 : vector<8x32xf32>
    %245 = vector.extract_strided_slice %166 {offsets = [0, 96], sizes = [8, 32], strides = [1, 1]} : vector<8x128xf32> to vector<8x32xf32>
    %246 = vector.extract_strided_slice %167 {offsets = [0, 96], sizes = [8, 32], strides = [1, 1]} : vector<8x128xf32> to vector<8x32xf32>
    %247 = vector.extract_strided_slice %168 {offsets = [0, 96], sizes = [8, 32], strides = [1, 1]} : vector<8x128xf32> to vector<8x32xf32>
    %cst_105 = arith.constant dense<0.000000e+00> : vector<8x8xf32>
    %248 = tpu.matmul %245, %246, %cst_105 {dimension_numbers = #tpu.dot_dimension_numbers<[1], [1], [0], [0], [0, 0, 1, 0], [], []>} : vector<8x32xf32>, vector<8x32xf32>, vector<8x8xf32> -> vector<8x8xf32>
    %cst_106 = arith.constant 0.176776692 : f32
    %249 = vector.broadcast %cst_106 : f32 to vector<8x8xf32>
    %250 = arith.mulf %248, %249 : vector<8x8xf32>
    %cst_107 = arith.constant -1.000000e+30 : f32
    %251 = vector.broadcast %cst_107 : f32 to vector<8x8xf32>
    %252 = arith.select %160, %250, %251 : vector<8x8xi1>, vector<8x8xf32>
    %cst_108 = arith.constant dense<0xFF800000> : vector<8xf32>
    %253 = vector.multi_reduction <maximumf>, %252, %cst_108 [1] : vector<8x8xf32> to vector<8xf32>
    %254 = vector.shape_cast %253 : vector<8xf32> to vector<8x1xf32>
    %255 = vector.broadcast %254 : vector<8x1xf32> to vector<8x8xf32>
    %256 = arith.subf %252, %255 : vector<8x8xf32>
    %257 = math.exp %256 : vector<8x8xf32>
    %cst_109 = arith.constant 0.000000e+00 : f32
    %258 = vector.broadcast %cst_109 : f32 to vector<8x8xf32>
    %259 = arith.select %160, %257, %258 : vector<8x8xi1>, vector<8x8xf32>
    %cst_110 = arith.constant dense<0.000000e+00> : vector<8xf32>
    %260 = vector.multi_reduction <add>, %259, %cst_110 [1] : vector<8x8xf32> to vector<8xf32>
    %261 = vector.shape_cast %260 : vector<8xf32> to vector<8x1xf32>
    %cst_111 = arith.constant 1.000000e-16 : f32
    %262 = vector.broadcast %cst_111 : f32 to vector<8x1xf32>
    %263 = arith.maximumf %261, %262 : vector<8x1xf32>
    %264 = tpu.reciprocal %263 {approx = true} : vector<8x1xf32> -> vector<8x1xf32>
    %265 = vector.broadcast %264 : vector<8x1xf32> to vector<8x8xf32>
    %266 = arith.mulf %259, %265 : vector<8x8xf32>
    %cst_112 = arith.constant dense<0.000000e+00> : vector<8x32xf32>
    %267 = tpu.matmul %266, %247, %cst_112 {dimension_numbers = #tpu.dot_dimension_numbers<[1], [0], [0], [1], [0, 0, 1, 1], [], []>} : vector<8x8xf32>, vector<8x32xf32>, vector<8x32xf32> -> vector<8x32xf32>
    %268 = vector.extract_strided_slice %169 {offsets = [0, 96], sizes = [8, 32], strides = [1, 1]} : vector<8x128xf32> to vector<8x32xf32>
    %269 = arith.addf %267, %268 : vector<8x32xf32>
    %270 = tpu.concatenate %194, %219, %244, %269 in 1 : vector<8x32xf32>, vector<8x32xf32>, vector<8x32xf32>, vector<8x32xf32> -> vector<8x128xf32>
    %cst_113 = arith.constant 0.000000e+00 : f32
    %271 = vector.broadcast %cst_113 : f32 to vector<8x128xf32>
    %272 = arith.maximumf %270, %271 : vector<8x128xf32>
    %c0_114 = arith.constant 0 : index
    %c0_115 = arith.constant 0 : index
    %273 = vector.load %arg17[%c0_114, %c0_115] : memref<128x128xf32, #tpu.memory_space<vmem>>, vector<128x128xf32>
    %cst_116 = arith.constant dense<0.000000e+00> : vector<8x128xf32>
    %274 = tpu.matmul %272, %273, %cst_116 {dimension_numbers = #tpu.dot_dimension_numbers<[1], [0], [0], [1], [0, 0, 1, 1], [], []>} : vector<8x128xf32>, vector<128x128xf32>, vector<8x128xf32> -> vector<8x128xf32>
    %c0_117 = arith.constant 0 : index
    %c0_118 = arith.constant 0 : index
    %275 = vector.load %arg18[%c0_117, %c0_118] : memref<1x128xf32, #tpu.memory_space<vmem>>, vector<1x128xf32>
    %276 = vector.broadcast %275 : vector<1x128xf32> to vector<8x128xf32>
    %277 = arith.addf %274, %276 : vector<8x128xf32>
    %278 = vector.extract_strided_slice %277 {offsets = [0, 0], sizes = [8, 32], strides = [1, 1]} : vector<8x128xf32> to vector<8x32xf32>
    %279 = vector.extract_strided_slice %277 {offsets = [0, 32], sizes = [8, 32], strides = [1, 1]} : vector<8x128xf32> to vector<8x32xf32>
    %280 = vector.extract_strided_slice %277 {offsets = [0, 64], sizes = [8, 32], strides = [1, 1]} : vector<8x128xf32> to vector<8x32xf32>
    %281 = vector.extract_strided_slice %277 {offsets = [0, 96], sizes = [8, 32], strides = [1, 1]} : vector<8x128xf32> to vector<8x32xf32>
    %282 = vector.extract_strided_slice %278 {offsets = [0, 0], sizes = [8, 16], strides = [1, 1]} : vector<8x32xf32> to vector<8x16xf32>
    %283 = vector.extract_strided_slice %279 {offsets = [0, 0], sizes = [8, 16], strides = [1, 1]} : vector<8x32xf32> to vector<8x16xf32>
    %284 = vector.extract_strided_slice %280 {offsets = [0, 0], sizes = [8, 16], strides = [1, 1]} : vector<8x32xf32> to vector<8x16xf32>
    %cst_119 = arith.constant dense<0.000000e+00> : vector<8x8xf32>
    %285 = tpu.matmul %282, %283, %cst_119 {dimension_numbers = #tpu.dot_dimension_numbers<[1], [1], [0], [0], [0, 0, 1, 0], [], []>} : vector<8x16xf32>, vector<8x16xf32>, vector<8x8xf32> -> vector<8x8xf32>
    %cst_120 = arith.constant 2.500000e-01 : f32
    %286 = vector.broadcast %cst_120 : f32 to vector<8x8xf32>
    %287 = arith.mulf %285, %286 : vector<8x8xf32>
    %cst_121 = arith.constant -1.000000e+30 : f32
    %288 = vector.broadcast %cst_121 : f32 to vector<8x8xf32>
    %289 = arith.select %160, %287, %288 : vector<8x8xi1>, vector<8x8xf32>
    %cst_122 = arith.constant dense<0xFF800000> : vector<8xf32>
    %290 = vector.multi_reduction <maximumf>, %289, %cst_122 [1] : vector<8x8xf32> to vector<8xf32>
    %291 = vector.shape_cast %290 : vector<8xf32> to vector<8x1xf32>
    %292 = vector.broadcast %291 : vector<8x1xf32> to vector<8x8xf32>
    %293 = arith.subf %289, %292 : vector<8x8xf32>
    %294 = math.exp %293 : vector<8x8xf32>
    %cst_123 = arith.constant 0.000000e+00 : f32
    %295 = vector.broadcast %cst_123 : f32 to vector<8x8xf32>
    %296 = arith.select %160, %294, %295 : vector<8x8xi1>, vector<8x8xf32>
    %cst_124 = arith.constant dense<0.000000e+00> : vector<8xf32>
    %297 = vector.multi_reduction <add>, %296, %cst_124 [1] : vector<8x8xf32> to vector<8xf32>
    %298 = vector.shape_cast %297 : vector<8xf32> to vector<8x1xf32>
    %cst_125 = arith.constant 1.000000e-16 : f32
    %299 = vector.broadcast %cst_125 : f32 to vector<8x1xf32>
    %300 = arith.maximumf %298, %299 : vector<8x1xf32>
    %301 = tpu.reciprocal %300 {approx = true} : vector<8x1xf32> -> vector<8x1xf32>
    %302 = vector.broadcast %301 : vector<8x1xf32> to vector<8x8xf32>
    %303 = arith.mulf %296, %302 : vector<8x8xf32>
    %cst_126 = arith.constant dense<0.000000e+00> : vector<8x16xf32>
    %304 = tpu.matmul %303, %284, %cst_126 {dimension_numbers = #tpu.dot_dimension_numbers<[1], [0], [0], [1], [0, 0, 1, 1], [], []>} : vector<8x8xf32>, vector<8x16xf32>, vector<8x16xf32> -> vector<8x16xf32>
    %305 = vector.extract_strided_slice %281 {offsets = [0, 0], sizes = [8, 16], strides = [1, 1]} : vector<8x32xf32> to vector<8x16xf32>
    %306 = arith.addf %304, %305 : vector<8x16xf32>
    %307 = vector.extract_strided_slice %278 {offsets = [0, 16], sizes = [8, 16], strides = [1, 1]} : vector<8x32xf32> to vector<8x16xf32>
    %308 = vector.extract_strided_slice %279 {offsets = [0, 16], sizes = [8, 16], strides = [1, 1]} : vector<8x32xf32> to vector<8x16xf32>
    %309 = vector.extract_strided_slice %280 {offsets = [0, 16], sizes = [8, 16], strides = [1, 1]} : vector<8x32xf32> to vector<8x16xf32>
    %cst_127 = arith.constant dense<0.000000e+00> : vector<8x8xf32>
    %310 = tpu.matmul %307, %308, %cst_127 {dimension_numbers = #tpu.dot_dimension_numbers<[1], [1], [0], [0], [0, 0, 1, 0], [], []>} : vector<8x16xf32>, vector<8x16xf32>, vector<8x8xf32> -> vector<8x8xf32>
    %cst_128 = arith.constant 2.500000e-01 : f32
    %311 = vector.broadcast %cst_128 : f32 to vector<8x8xf32>
    %312 = arith.mulf %310, %311 : vector<8x8xf32>
    %cst_129 = arith.constant -1.000000e+30 : f32
    %313 = vector.broadcast %cst_129 : f32 to vector<8x8xf32>
    %314 = arith.select %160, %312, %313 : vector<8x8xi1>, vector<8x8xf32>
    %cst_130 = arith.constant dense<0xFF800000> : vector<8xf32>
    %315 = vector.multi_reduction <maximumf>, %314, %cst_130 [1] : vector<8x8xf32> to vector<8xf32>
    %316 = vector.shape_cast %315 : vector<8xf32> to vector<8x1xf32>
    %317 = vector.broadcast %316 : vector<8x1xf32> to vector<8x8xf32>
    %318 = arith.subf %314, %317 : vector<8x8xf32>
    %319 = math.exp %318 : vector<8x8xf32>
    %cst_131 = arith.constant 0.000000e+00 : f32
    %320 = vector.broadcast %cst_131 : f32 to vector<8x8xf32>
    %321 = arith.select %160, %319, %320 : vector<8x8xi1>, vector<8x8xf32>
    %cst_132 = arith.constant dense<0.000000e+00> : vector<8xf32>
    %322 = vector.multi_reduction <add>, %321, %cst_132 [1] : vector<8x8xf32> to vector<8xf32>
    %323 = vector.shape_cast %322 : vector<8xf32> to vector<8x1xf32>
    %cst_133 = arith.constant 1.000000e-16 : f32
    %324 = vector.broadcast %cst_133 : f32 to vector<8x1xf32>
    %325 = arith.maximumf %323, %324 : vector<8x1xf32>
    %326 = tpu.reciprocal %325 {approx = true} : vector<8x1xf32> -> vector<8x1xf32>
    %327 = vector.broadcast %326 : vector<8x1xf32> to vector<8x8xf32>
    %328 = arith.mulf %321, %327 : vector<8x8xf32>
    %cst_134 = arith.constant dense<0.000000e+00> : vector<8x16xf32>
    %329 = tpu.matmul %328, %309, %cst_134 {dimension_numbers = #tpu.dot_dimension_numbers<[1], [0], [0], [1], [0, 0, 1, 1], [], []>} : vector<8x8xf32>, vector<8x16xf32>, vector<8x16xf32> -> vector<8x16xf32>
    %330 = vector.extract_strided_slice %281 {offsets = [0, 16], sizes = [8, 16], strides = [1, 1]} : vector<8x32xf32> to vector<8x16xf32>
    %331 = arith.addf %329, %330 : vector<8x16xf32>
    %332 = tpu.concatenate %306, %331 in 1 : vector<8x16xf32>, vector<8x16xf32> -> vector<8x32xf32>
    %c0_135 = arith.constant 0 : index
    %c0_136 = arith.constant 0 : index
    %333 = vector.load %arg20[%c0_135, %c0_136] : memref<8x8xf32, #tpu.memory_space<vmem>>, vector<8x8xf32>
    %cst_137 = arith.constant dense<0.000000e+00> : vector<8x32xf32>
    %334 = tpu.matmul %333, %332, %cst_137 {dimension_numbers = #tpu.dot_dimension_numbers<[1], [0], [0], [1], [0, 0, 1, 1], [], []>} : vector<8x8xf32>, vector<8x32xf32>, vector<8x32xf32> -> vector<8x32xf32>
    %c0_138 = arith.constant 0 : index
    %c0_139 = arith.constant 0 : index
    %335 = vector.load %arg21[%c0_138, %c0_139] : memref<8x8xf32, #tpu.memory_space<vmem>>, vector<8x8xf32>
    %cst_140 = arith.constant dense<0.000000e+00> : vector<8x32xf32>
    %336 = tpu.matmul %335, %332, %cst_140 {dimension_numbers = #tpu.dot_dimension_numbers<[1], [0], [0], [1], [0, 0, 1, 1], [], []>} : vector<8x8xf32>, vector<8x32xf32>, vector<8x32xf32> -> vector<8x32xf32>
    %337 = arith.mulf %334, %336 : vector<8x32xf32>
    %cst_141 = arith.constant dense<0.000000e+00> : vector<8xf32>
    %338 = vector.multi_reduction <add>, %337, %cst_141 [1] : vector<8x32xf32> to vector<8xf32>
    %339 = vector.shape_cast %338 : vector<8xf32> to vector<8x1xf32>
    %340 = vector.shape_cast %339 : vector<8x1xf32> to vector<8x1xf32>
    %341 = vector.broadcast %340 : vector<8x1xf32> to vector<8x128xf32>
    %c0_142 = arith.constant 0 : index
    %c0_143 = arith.constant 0 : index
    %342 = vector.load %arg22[%c0_142, %c0_143] : memref<8x128xf32, #tpu.memory_space<vmem>>, vector<8x128xf32>
    tpu.vector_store %arg22[%c0_142, %c0_143], %341 {strides = array<i32>} : memref<8x128xf32, #tpu.memory_space<vmem>>, vector<8x128xf32>,
    return
  }
}

</mosaic_0001>

<bundles_post_ra>
// kernel: gcn_net_forward.1
= control target key start
LH: loop header
LB: loop body
LE: loop exit
PB: predicated region body
PF: predicated region fallthrough
CT: control target
= control target key end

     0   :  { %vm83_vm0 = vcmask 474112   ;;  %vm96_vm1 = vcmask 1041408   ;;  %vm3306_vm2 = vmmov 1   ;;  %vm196_vm4 = vcmask 261120   ;;  %s4112_s3 = inlined_call_operand.vmem [shape: f32[58,32], index: 3, kind: input, shape index: {}]   ;;  %s4113_s0 = inlined_call_operand.vmem [shape: f32[32,58], index: 0, kind: input, shape index: {}]   ;;  %s4114_s1 = inlined_call_operand.vmem [shape: f32[32,32], index: 1, kind: input, shape index: {}]   ;;  %s4115_s9 = inlined_call_operand.vmem [shape: f32[24,32], index: 9, kind: input, shape index: {}]   ;;  %s4116_s6 = inlined_call_operand.vmem [shape: f32[4,24], index: 6, kind: input, shape index: {}]   ;;  %s4117_s4 = inlined_call_operand.vmem [shape: f32[1,32], index: 4, kind: input, shape index: {}]   ;;  %s4118_s7 = inlined_call_operand.vmem [shape: f32[16,32], index: 7, kind: input, shape index: {}]   ;;  %s4119_s2 = inlined_call_operand.vmem [shape: f32[4,32], index: 2, kind: input, shape index: {}]   ;;  %s4120_s5 = inlined_call_operand.vmem [shape: f32[4,16], index: 5, kind: input, shape index: {}]   ;;  %s4121_s11 = inlined_call_operand.vmem [shape: f32[32,128], index: 11, kind: input, shape index: {}]   ;;  %s4122_s12 = inlined_call_operand.vmem [shape: f32[128,8], index: 12, kind: input, shape index: {}]   ;;  %s4123_s10 = inlined_call_operand.vmem [shape: f32[1,32], index: 10, kind: input, shape index: {}]   ;;  %s4124_s8 = inlined_call_operand.vmem [shape: f32[1,32], index: 8, kind: input, shape index: {}]   ;;  %s4125_s14 = inlined_call_operand.vmem [shape: f32[8,8], index: 14, kind: input, shape index: {}]   ;;  %s4126_s15 = inlined_call_operand.vmem [shape: f32[128,512], index: 15, kind: input, shape index: {}]   ;;  %s4127_s13 = inlined_call_operand.vmem [shape: f32[1,128], index: 13, kind: input, shape index: {}]   ;;  %s4128_s16 = inlined_call_operand.vmem [shape: f32[1,512], index: 16, kind: input, shape index: {}]   ;;  %s4129_s19 = inlined_call_operand.vmem [shape: f32[8,8], index: 19, kind: input, shape index: {}]   ;;  %s4130_s17 = inlined_call_operand.vmem [shape: f32[128,128], index: 17, kind: input, shape index: {}]   ;;  %s4131_s18 = inlined_call_operand.vmem [shape: f32[1,128], index: 18, kind: input, shape index: {}]   ;;  %s4132_s20 = inlined_call_operand.vmem [shape: f32[8,8], index: 20, kind: input, shape index: {}]   ;;  %s4133_s21 = inlined_call_operand.vmem [shape: f32[8,8], index: 21, kind: input, shape index: {}]   ;;  %s4134_s22 = inlined_call_operand.vmem [shape: f32[8,128], index: 22, kind: output, shape index: {}]  }
   0x1   :  { %4140 = sst [smem:[#allocation2_spill]] %s4112_s3  ;;  %vm3103_vm3 = vmpackc.low %vm96_vm1, %vm3306_vm2  ;;  %v3307_v26 = vmov 0.0|0.0   ;;  %vm3308_vm5 = vmmov 0   ;;  %v3309_v29 = vmov 0.0   ;;  %vm470_vm6 = vcmask 195584   ;;  %v550_v53 = vld [vmem:[%s4121_s11] sm:$0xff] }
   0x2   :  { %4141 = sst [smem:[#allocation3_spill]] %s4113_s0  ;;  %s4147_s29 = sld [smem:[#allocation2_spill]]  ;;  %v298_v50 = vld [vmem:[%s4119_s2] sm:$0xf]  ;;  %vm382_vm7 = vcmask 130048   ;;  %v551_v54 = vld [vmem:[%s4121_s11 + $0x8] sm:$0xff] }
   0x3   :  { %4142 = sst [smem:[#allocation4_spill]] %s4114_s1  ;;  %v372_v52 = vld [vmem:[%s4120_s5] sm:$0xf]  ;;  %v3129_v56 = vpack.c.bf16 %v551_v54, %v550_v53  ;;  %v552_v58 = vld [vmem:[%s4121_s11 + $0x10] sm:$0xff]  ;;  %v553_v59 = vld [vmem:[%s4121_s11 + $0x18] sm:$0xff]  ;;  %vm548_vm8 = vcmask 1043456  }
   0x4   :  { %4143 = sst [smem:[#allocation5_spill]] %s4115_s9  ;;  %s4148_s9 = sld [smem:[#allocation3_spill]]  ;;  %v3132_v60 = vpack.c.bf16 %v553_v59, %v552_v58  ;;  %v627_v61 = vld [vmem:[%s4122_s12] sm:$0xff]  ;;  %v628_v62 = vld [vmem:[%s4122_s12 + $0x8] sm:$0xff]  ;;  %v629_v63 = vld [vmem:[%s4122_s12 + $0x10] sm:$0xff]  ;;  %vm761_vm12 = vcmask 64512  }
   0x5   :  { %4144 = sst [smem:[#allocation6_spill]] %s4116_s6  ;;  %s4149_s1 = sld [smem:[#allocation4_spill]]  ;;  %v3635_v59 = vld [vmem:[%s4125_s14] sm:$0xff]  ;;  %vm1168_vm15 = vcmask 523264  }
   0x6   :  { %4145 = sst [smem:[#allocation7_spill]] %s4117_s4  ;;  %s4150_s4 = sld [smem:[#allocation5_spill]]  ;;  %vm746_vm9 = vcmp.gt.f32.partialorder %v3635_v59, 0.0 }
   0x7   :  { %4146 = sst [smem:[#allocation8_spill]] %s4118_s7  ;;  %s4151_s27 = sld [smem:[#allocation6_spill]] }
   0x8   :  { %v75_v0 = vld [vmem:[%s4147_s29] sm:$0xff]  ;;  %v76_v1 = vld [vmem:[%s4147_s29 + $0x8] sm:$0xff]  ;;  %v77_v2 = vld [vmem:[%s4147_s29 + $0x10] sm:$0xff]  ;;  %s4152_s30 = sld [smem:[#allocation7_spill]]  ;;  %s4153_s23 = sld [smem:[#allocation8_spill]] }
   0x9   :  { %v3090_v3 = vpack.c.bf16 %v76_v1, %v75_v0  ;;  %v78_v4 = vld [vmem:[%s4147_s29 + $0x18] sm:$0xff]  ;;  %v79_v6 = vld [vmem:[%s4147_s29 + $0x20] sm:$0xff]  ;;  %v80_v7 = vld [vmem:[%s4147_s29 + $0x28] sm:$0xff]  ;;  %v3135_v0 = vpack.c.bf16 %v628_v62, %v627_v61  ;;  %s3315_s14 = smov 96   ;;  %s3316_s6 = smov 32  }
   0xa   :  { %v3094_v5 = vpack.c.bf16 %v78_v4, %v77_v2  ;;  %v71_v8 = vld [vmem:[%s4148_s9] sm:$0xff]  ;;  %v3098_v9 = vpack.c.bf16 %v80_v7, %v79_v6  ;;  %v81_v10 = vld [vmem:[%s4147_s29 + $0x30] sm:$0xff]  ;;  %v82_v11 = vld [vmem:[%s4147_s29 + $0x38] sm:$0x3]  ;;  %s3320_s11 = smov 48  }
   0xb   :  { %3091 = vmatprep.subr.bf16.mxu0 %v3090_v3  ;;  %2872 = vmatprep.mubr.msk.f32.mxu0 %vm83_vm0, %v71_v8  ;;  %v3102_v12 = vpack.c.bf16 %v82_v11, %v81_v10  ;;  %v72_v13 = vld [vmem:[%s4148_s9 + $0x8] sm:$0xff]  ;;  %v73_v14 = vld [vmem:[%s4148_s9 + $0x10] sm:$0xff]  ;;  %v74_v15 = vld [vmem:[%s4148_s9 + $0x18] sm:$0xff] }
   0xc   :  { %3093 = vmatpush3.bf16.msra.mxu0 %v3090_v3  ;;  %v185_v16 = vld [vmem:[%s4149_s1] sm:$0xff]  ;;  %v186_v23 = vld [vmem:[%s4149_s1 + $0x8] sm:$0xff]  ;;  %v187_v24 = vld [vmem:[%s4149_s1 + $0x10] sm:$0xff] }
   0xd   :  { %3095 = vmatprep.subr.bf16.mxu0 %v3094_v5  ;;  %2886 = vmatprep.mubr.msk.f32.mxu1 %vm196_vm4, %v185_v16  ;;  %v188_v25 = vld [vmem:[%s4149_s1 + $0x18] sm:$0xff]  ;;  %v460_v27 = vld [vmem:[%s4150_s4] sm:$0xff]  ;;  %v461_v28 = vld [vmem:[%s4150_s4 + $0x8] sm:$0xff] }
   0xe   :  { %v3126_v30 = vpack.c.bf16 %v461_v28, %v460_v27  ;;  %v462_v31 = vld [vmem:[%s4150_s4 + $0x10] sm:$0xff]  ;;  %v459_v32 = vld [vmem:[%s4151_s27] sm:$0xf]  ;;  %v374_v48 = vld [vmem:[%s4153_s23 + $0x8] sm:$0xff] }
   0xf   :  { %v2712_v33 = vld [vmem:[%s4152_s30] ss:$0 sm:$0xff]  ;;  %v630_v1 = vld [vmem:[%s4122_s12 + $0x18] sm:$0xff]  ;;  %v632_v4 = vld [vmem:[%s4122_s12 + $0x28] sm:$0xff] }
  0x10   :  { %3097 = vmatpush3.bf16.msra.mxu0 %v3094_v5  ;;  %v373_v47 = vld [vmem:[%s4153_s23] sm:$0xff]  ;;  %v3138_v2 = vpack.c.bf16 %v630_v1, %v629_v63  ;;  %v633_v6 = vld [vmem:[%s4122_s12 + $0x30] sm:$0xff]  ;;  %v634_v7 = vld [vmem:[%s4122_s12 + $0x38] sm:$0xff] }
  0x11   :  { %3099 = vmatprep.subr.bf16.mxu0 %v3098_v9  ;;  %v3123_v51 = vpack.c.bf16 %v374_v48, %v373_v47  ;;  %v631_v3 = vld [vmem:[%s4122_s12 + $0x20] sm:$0xff]  ;;  %v3144_v8 = vpack.c.bf16 %v634_v7, %v633_v6  ;;  %v636_v10 = vld [vmem:[%s4122_s12 + $0x48] sm:$0xff] }
  0x12   :  { %v3141_v5 = vpack.c.bf16 %v632_v4, %v631_v3  ;;  %v640_v16 = vld [vmem:[%s4122_s12 + $0x68] sm:$0xff] }
  0x14   :  { %3101 = vmatpush3.bf16.msra.mxu0 %v3098_v9  ;;  %v635_v9 = vld [vmem:[%s4122_s12 + $0x40] sm:$0xff] }
  0x15   :  { %3104 = vmatprep.subr.msk.bf16.mxu0 %vm3103_vm3, %v3102_v12  ;;  %v3147_v11 = vpack.c.bf16 %v636_v10, %v635_v9 }
  0x18   :  { %3107 = vmatpush3.bf16.msk.msra.mxu0 %vm3103_vm3, %v3102_v12  ;;  %v637_v12 = vld [vmem:[%s4122_s12 + $0x50] sm:$0xff] }
  0x19   :  { %3125 = vmatprep.subr.bf16.mxu0 %v3307_v26 }
  0x1b   :  { %2873 = vmatmul.mubr.msk.f32.vlgmr.msra.gmra.mrb[0].mxu0 %vm83_vm0, %v72_v13  ;;  %v638_v13 = vld [vmem:[%s4122_s12 + $0x58] sm:$0xff] }
  0x1c   :  { %2875 = vmatprep.mubr.msk.f32.mxu0 %vm83_vm0, %v73_v14  ;;  %3127 = vmatpush3.bf16.msra.mxu0 %v3126_v30  ;;  %v3150_v14 = vpack.c.bf16 %v638_v13, %v637_v12 }
  0x1d   :  { %2914 = vmatprep.subr.mxu0 %v3309_v29 }
  0x1f   :  { %2876 = vmatmul.mubr.msk.f32.gmra.mrb[2].mxu0 %vm83_vm0, %v74_v15  ;;  %v639_v15 = vld [vmem:[%s4122_s12 + $0x60] sm:$0xff]  ;;  %vm1170_vm0 = vcmask 785408  }
  0x20   :  { %2916 = vmatprep.mubr.msk.f32.mxu0 %vm3308_vm5, %v3309_v29  ;;  %2915 = vmatpush3.msra.mxu0 %v462_v31 }
  0x21   :  { %3134 = vmatprep.subr.bf16.mxu0 %v3307_v26 }
  0x23   :  { %2917 = vmatmul.mubr.msk.f32.vlgmr.msra.gmra.mrb[4].mxu0 %vm470_vm6, %v459_v32 }
  0x24   :  { %2962 = vmatprep.mubr.msk.f32.mxu0 %vm3308_vm5, %v3309_v29  ;;  %3136 = vmatpush3.bf16.msra.mxu0 %v3135_v0 }
  0x25   :  { %3137 = vmatprep.subr.bf16.mxu0 %v3307_v26 }
  0x28   :  { %3139 = vmatpush3.bf16.msra.mxu0 %v3138_v2 }
  0x29   :  { %3140 = vmatprep.subr.bf16.mxu0 %v3307_v26 }
  0x2c   :  { %3142 = vmatpush3.bf16.msra.mxu0 %v3141_v5 }
  0x2d   :  { %3143 = vmatprep.subr.bf16.mxu0 %v3307_v26 }
  0x30   :  { %3145 = vmatpush3.bf16.msra.mxu0 %v3144_v8 }
  0x31   :  { %3146 = vmatprep.subr.bf16.mxu0 %v3307_v26 }
  0x34   :  { %3148 = vmatpush3.bf16.msra.mxu0 %v3147_v11 }
  0x35   :  { %3149 = vmatprep.subr.bf16.mxu0 %v3307_v26 }
  0x38   :  { %3151 = vmatpush3.bf16.msra.mxu0 %v3150_v14 }
  0x39   :  { %3152 = vmatprep.subr.bf16.mxu0 %v3307_v26 }
  0xee   :  { %v2874_v17 = vpop.f32.mrb[0].mxu0 }
  0xef   :  { %v166_v18 = vpop.f32.mrb[1].mxu0 }
  0xf0   :  { %v3108_v19 = vpack.c.bf16 %v2874_v17, %v166_v18  ;;  %v3153_v17 = vpack.c.bf16 %v640_v16, %v639_v15  ;;  %v641_v18 = vld [vmem:[%s4122_s12 + $0x70] sm:$0xff] }
  0xf2   :  { %v2877_v20 = vpop.f32.mrb[2].mxu0  ;;  %3109 = vmatprep.subr.bf16.mxu1 %v3108_v19  ;;  %3154 = vmatpush3.bf16.msra.mxu0 %v3153_v17 }
  0xf3   :  { %v176_v21 = vpop.f32.mrb[3].mxu0  ;;  %3111 = vmatpush3.bf16.msra.mxu1 %v3108_v19  ;;  %v642_v19 = vld [vmem:[%s4122_s12 + $0x78] sm:$0xff]  ;;  %3155 = vmatprep.subr.bf16.mxu0 %v3307_v26  ;;  %s3314_s12 = smov 64  }
  0xf4   :  { %v3112_v22 = vpack.c.bf16 %v2877_v20, %v176_v21  ;;  %v3156_v20 = vpack.c.bf16 %v642_v19, %v641_v18  ;;  %v2720_v21 = vld [vmem:[%s4123_s10] ss:$0 sm:$0xff] }
  0xf6   :  { %3113 = vmatprep.subr.bf16.mxu1 %v3112_v22  ;;  %v540_v55 = vpop.f32.mrb[4].mxu0  ;;  %3157 = vmatpush3.bf16.msra.mxu0 %v3156_v20 }
  0xf7   :  { %3115 = vmatpush3.bf16.msra.mxu1 %v3112_v22  ;;  %v2918_v57 = vpop.f32.mrb[5].mxu0 }
  0xf8   :  { %3116 = vmatprep.subr.bf16.mxu1 %v3307_v26 }
  0xfa   :  { %2887 = vmatmul.mubr.msk.f32.vlgmr.msra.gmra.mrb[0].mxu1 %vm196_vm4, %v186_v23 }
  0xfb   :  { %2889 = vmatprep.mubr.msk.f32.mxu1 %vm196_vm4, %v187_v24  ;;  %v541_v24 = vadd.f32 %v2720_v21, %v540_v55 }
  0xfd   :  { %v544_v31 = vmax.f32 %v541_v24, 0.0 }
  0xfe   :  { %2890 = vmatmul.mubr.msk.f32.gmra.mrb[2].mxu1 %vm196_vm4, %v188_v25  ;;  %v2718_v25 = vld [vmem:[%s4124_s8] ss:$0 sm:$0xff] }
  0xff   :  { %2900 = vmatprep.mubr.msk.f32.mxu1 %vm3308_vm5, %v3309_v29 }
 0x1cd   :  { %v2888_v34 = vpop.f32.mrb[0].mxu1 }
 0x1ce   :  { %v281_v35 = vadd.f32 %v2888_v34, %v2712_v33  ;;  %v275_v36 = vpop.f32.mrb[1].mxu1  ;;  %v546_v34 = vrot.slane %v544_v31, 4 }
 0x1cf   :  { %v276_v37 = vadd.f32 %v2712_v33, %v275_v36 }
 0x1d0   :  { %v295_v38 = vmax.f32 %v281_v35, 0.0 }
 0x1d1   :  { %v294_v39 = vmax.f32 %v276_v37, 0.0  ;;  %v2891_v40 = vpop.f32.mrb[2].mxu1  ;;  %v3310_v37 = vmov 5  }
 0x1d2   :  { %v291_v41 = vadd.f32 %v2891_v40, %v2712_v33  ;;  %v285_v42 = vpop.f32.mrb[3].mxu1  ;;  %3263 = vset.pattern.permute.xlu1 %v3310_v37 }
 0x1d3   :  { %v3117_v43 = vpack.c.bf16 %v295_v38, %v294_v39  ;;  %v286_v44 = vadd.f32 %v2712_v33, %v285_v42  ;;  %v3311_v38 = vmov 1  }
 0x1d4   :  { %v297_v45 = vmax.f32 %v291_v41, 0.0  ;;  %3261 = vset.pattern.permute.xlu0 %v3311_v38 }
 0x1d5   :  { %v296_v46 = vmax.f32 %v286_v44, 0.0  ;;  %3118 = vmatpush3.bf16.msra.mxu1 %v3117_v43  ;;  %v3312_v43 = vmov 7   ;;  %v3313_v44 = vmov 3  }
 0x1d6   :  { %3119 = vmatprep.subr.bf16.mxu1 %v3307_v26 }
 0x1d7   :  { %v3120_v49 = vpack.c.bf16 %v297_v45, %v296_v46  ;;  %v752_v45 = vlaneseq }
 0x1d9   :  { %3121 = vmatpush3.bf16.msra.mxu1 %v3120_v49  ;;  %v3622_v47 = vshrl.u32 %v752_v45, 7 }
 0x1da   :  { %3122 = vmatprep.subr.bf16.mxu1 %v3307_v26 }
 0x1db   :  { %v1059_v53 = vsub.s32 6, %v3622_v47 }
 0x1dc   :  { %2901 = vmatmul.mubr.msk.f32.vlgmr.msra.gmra.mrb[4].mxu1 %vm196_vm4, %v298_v50  ;;  %v754_v50 = vsub.s32 0, %v3622_v47 }
 0x1dd   :  { %3124 = vmatpush3.bf16.msra.mxu1 %v3123_v51  ;;  %2907 = vmatprep.mubr.msk.f32.mxu1 %vm3308_vm5, %v3309_v29  ;;  %v854_v51 = vsub.s32 2, %v3622_v47 }
 0x1de   :  { %3128 = vmatprep.subr.bf16.mxu1 %v3307_v26 }
 0x1e0   :  { %2908 = vmatmul.mubr.msk.f32.vlgmr.msra.gmra.mrb[6].mxu1 %vm382_vm7, %v372_v52  ;;  %v957_v52 = vsub.s32 4, %v3622_v47 }
 0x1e1   :  { %2927 = vmatprep.mubr.msk.f32.mxu1 %vm3308_vm5, %v3309_v29  ;;  %3130 = vmatpush3.bf16.msra.mxu1 %v3129_v56 }
 0x1e2   :  { %3131 = vmatprep.subr.bf16.mxu1 %v3307_v26 }
 0x1e5   :  { %3133 = vmatpush3.bf16.msra.mxu1 %v3132_v60 }
 0x1e6   :  { %2965 = vmatprep.subr.mxu1 %v3309_v29 }
 0x2af   :  { %v368_v22 = vpop.f32.mrb[4].mxu1 }
 0x2b0   :  { %v2902_v23 = vpop.f32.mrb[5].mxu1 }
 0x2b3   :  { %v452_v27 = vpop.f32.mrb[6].mxu1 }
 0x2b4   :  { %v453_v28 = vadd.f32 %v2718_v25, %v452_v27  ;;  %v2909_v30 = vpop.f32.mrb[7].mxu1 }
 0x2b6   :  { %v456_v32 = vmax.f32 %v453_v28, 0.0 }
 0x2b8   :  { %v457_v33 = vadd.f32 %v456_v32, %v368_v22 }
 0x2ba   :  { %v458_v35 = vmul.f32 0.5, %v457_v33 }
 0x2bc   :  { %v549_v36 = vsel %vm548_vm8, %v458_v35, %v546_v34 }
 0x2bd   :  { %2928 = vmatmul.mubr.msk.f32.vlgmr.msra.gmra.mrb[8].mxu1 %vm196_vm4, %v549_v36 }
 0x2be   :  { %2967 = vmatprep.mubr.msk.f32.mxu1 %vm3308_vm5, %v3309_v29 }
 0x390   :  { %v3616_v39 = vpop.f32.mrb[8].mxu1 }
 0x391   :  { %v2929_v40 = vpop.f32.mrb[9].mxu1  ;;  %2963 = vmatmul.mubr.f32.vlgmr.msra.gmra.mrb[6].mxu0 %v3616_v39  ;;  %2966 = vmatpush3.msra.mxu1 %v3616_v39 }
 0x392   :  { %2970 = vmatprep.subr.mxu1 %v3309_v29  ;;  %1404 = vmatprep.mubr.f32.mxu0 %v3309_v29 }
 0x464   :  { %v709_v41 = vpop.f32.mrb[6].mxu0 }
 0x465   :  { %952 = vperm.xlu1 %3263, %v709_v41   ;;  %749 = vperm.xlu0 %3261, %v709_v41   ;;  %v2964_v42 = vpop.f32.mrb[7].mxu0 }
 0x469   :  { %3264 = vset.pattern.permute.xlu1 %v3312_v43  ;;  %3262 = vset.pattern.permute.xlu0 %v3313_v44 }
 0x46a   :  { %1054 = vperm.xlu1 %3264, %v709_v41   ;;  %849 = vperm.xlu0 %3262, %v709_v41  }
 0x46e   :  { %3265 = vset.pattern.permute.xlu0 %v3312_v43 }
 0x493   :  { %713 = vxpose.xlu1.b32.start.end [1/1] (short) (narrow) %v709_v41, 8 }
 0x4e4   :  { %v953_v46 = vpop.permute.xlu1 %952  ;;  %v750_v48 = vpop.permute.xlu0 %749 }
 0x4e9   :  { %v1055_v49 = vpop.permute.xlu1 %1054  ;;  %v850_v60 = vpop.permute.xlu0 %849 }
 0x513   :  { %v729_v54 = vpop.trf.xlu1 }
 0x514   :  { %v755_v55 = vrot.slane %v729_v54, %v754_v50  ;;  %v855_v56 = vrot.slane %v729_v54, %v854_v51  ;;  %v958_v57 = vrot.slane %v729_v54, %v957_v52  ;;  %v1060_v58 = vrot.slane %v729_v54, %v1059_v53 }
 0x516   :  { %v1061_v61 = vadd.f32 %v1060_v58, %v1055_v49  ;;  %v756_v62 = vadd.f32 %v755_v55, %v750_v48  ;;  %v856_v63 = vadd.f32 %v855_v56, %v850_v60  ;;  %v959_v0 = vadd.f32 %v958_v57, %v953_v46 }
 0x518   :  { %vm1062_vm10 = vcmp.gt.f32.partialorder %v1061_v61, 0.0  ;;  %v1063_v1 = vmul.f32 0.2, %v1061_v61  ;;  %vm757_vm11 = vcmp.gt.f32.partialorder %v756_v62, 0.0  ;;  %v758_v2 = vmul.f32 0.2, %v756_v62 }
 0x519   :  { %vm857_vm13 = vcmp.gt.f32.partialorder %v856_v63, 0.0  ;;  %v858_v3 = vmul.f32 0.2, %v856_v63  ;;  %v961_v6 = vmul.f32 0.2, %v959_v0  ;;  %vm960_vm14 = vcmp.gt.f32.partialorder %v959_v0, 0.0 }
 0x51a   :  { %v1064_v4 = vsel %vm1062_vm10, %v1061_v61, %v1063_v1  ;;  %v759_v5 = vsel %vm757_vm11, %v756_v62, %v758_v2  ;;  %v1184_v1 = vld [vmem:[%s4126_s15 + $0x8] sm:$0xff] }
 0x51b   :  { %v1065_v7 = vsel %vm746_vm9, %v1064_v4, -1e+30  ;;  %v760_v8 = vsel %vm746_vm9, %v759_v5, -1e+30  ;;  %v859_v9 = vsel %vm857_vm13, %v856_v63, %v858_v3  ;;  %v962_v13 = vsel %vm960_vm14, %v959_v0, %v961_v6  ;;  %v1188_v2 = vld [vmem:[%s4126_s15 + $0x28] sm:$0xff]  ;;  %v1186_v3 = vld [vmem:[%s4126_s15 + $0x18] sm:$0xff] }
 0x51c   :  { %v1066_v10 = vsel %vm761_vm12, %v1065_v7, -inf  ;;  %v762_v11 = vsel %vm761_vm12, %v760_v8, -inf  ;;  %v860_v12 = vsel %vm746_vm9, %v859_v9, -1e+30  ;;  %v963_v15 = vsel %vm746_vm9, %v962_v13, -1e+30 }
 0x51d   :  { %1067 = vmax.xlane.f32.xlu1 %v1066_v10  ;;  %763 = vmax.xlane.f32.xlu0 %v762_v11  ;;  %v861_v14 = vsel %vm761_vm12, %v860_v12, -inf  ;;  %v964_v16 = vsel %vm761_vm12, %v963_v15, -inf  ;;  %v3158_v4 = vpack.c.bf16 %v1188_v2, %v1184_v1  ;;  %v1190_v5 = vld [vmem:[%s4126_s15 + $0x38] sm:$0xff]  ;;  %v1183_v6 = vld [vmem:[%s4126_s15] sm:$0xff]  ;;  %v1185_v10 = vld [vmem:[%s4126_s15 + $0x10] sm:$0xff] }
 0x51e   :  { %v1189_v11 = vld [vmem:[%s4126_s15 + $0x30] sm:$0xff]  ;;  %v1224_v2 = vld [vmem:[%s4126_s15 + $0x148] sm:$0xff] }
 0x51f   :  { %v3192_v13 = vpack.c.bf16 %v1189_v11, %v1185_v10  ;;  %v1225_v11 = vld [vmem:[%s4126_s15 + $0x150] sm:$0xff] }
 0x521   :  { %862 = vmax.xlane.f32.xlu0 %v861_v14  ;;  %v1196_v14 = vld [vmem:[%s4126_s15 + $0x68] sm:$0xff] }
 0x525   :  { %965 = vmax.xlane.f32.xlu0 %v964_v16  ;;  %v1198_v16 = vld [vmem:[%s4126_s15 + $0x78] sm:$0xff] }
 0x52e   :  { %977 = vrot.lane.b32.xlu1 %v3616_v39, %s3314_s12 }
 0x53b   :  { %875 = vrot.lane.b32.xlu0 %v3616_v39, %s3315_s14 }
 0x5aa   :  { %v764_v17 = vpop.xlane.xlu0 %763  ;;  %v1068_v19 = vpop.xlane.xlu1 %1067 }
 0x5ab   :  { %v765_v18 = vsub.f32 %v760_v8, %v764_v17  ;;  %v1069_v23 = vsub.f32 %v1065_v7, %v1068_v19  ;;  %v1187_v7 = vld [vmem:[%s4126_s15 + $0x20] sm:$0xff]  ;;  %v3190_v8 = vpack.c.bf16 %v1190_v5, %v1186_v3  ;;  %v1228_v3 = vld [vmem:[%s4126_s15 + $0x168] sm:$0xff] }
 0x5ac   :  { %v3160_v9 = vpack.c.bf16 %v1187_v7, %v1183_v6  ;;  %v1191_v19 = vld [vmem:[%s4126_s15 + $0x40] sm:$0xff]  ;;  %v3178_v5 = vpack.c.bf16 %v1228_v3, %v1224_v2  ;;  %v1230_v6 = vld [vmem:[%s4126_s15 + $0x178] sm:$0xff] }
 0x5ad   :  { %v766_v20 = vmul.f32 1.442695, %v765_v18  ;;  %v1070_v28 = vmul.f32 1.442695, %v1069_v23  ;;  %3191 = vmatprep.subr.bf16.mxu0 %v3190_v8  ;;  %v1197_v23 = vld [vmem:[%s4126_s15 + $0x70] sm:$0xff]  ;;  %v1223_v7 = vld [vmem:[%s4126_s15 + $0x140] sm:$0xff] }
 0x5ae   :  { %v863_v21 = vpop.xlane.xlu0 %862  ;;  %v978_v59 = vpop.permute.xlu1 %977  ;;  %3193 = vmatpush1.bf16.msra.mxu0 %v3192_v13  ;;  %v1227_v8 = vld [vmem:[%s4126_s15 + $0x160] sm:$0xff] }
 0x5af   :  { %v864_v22 = vsub.f32 %v860_v12, %v863_v21  ;;  %3266 = vpow2.f32 %v766_v20  ;;  %v1192_v12 = vld [vmem:[%s4126_s15 + $0x48] sm:$0xff]  ;;  %v1195_v20 = vld [vmem:[%s4126_s15 + $0x60] sm:$0xff]  ;;  %v1193_v21 = vld [vmem:[%s4126_s15 + $0x50] sm:$0xff]  ;;  %v3180_v10 = vpack.c.bf16 %v1227_v8, %v1223_v7 }
 0x5b0   :  { %v3162_v17 = vpack.c.bf16 %v1196_v14, %v1192_v12  ;;  %v1229_v12 = vld [vmem:[%s4126_s15 + $0x170] sm:$0xff]  ;;  %v1232_v14 = vld [vmem:[%s4126_s15 + $0x188] sm:$0xff] }
 0x5b1   :  { %v865_v24 = vmul.f32 1.442695, %v864_v22  ;;  %v3164_v22 = vpack.c.bf16 %v1195_v20, %v1191_v19  ;;  %v3212_v13 = vpack.c.bf16 %v1229_v12, %v1225_v11  ;;  %v1231_v19 = vld [vmem:[%s4126_s15 + $0x180] sm:$0xff] }
 0x5b2   :  { %v966_v25 = vpop.xlane.xlu0 %965  ;;  %v1235_v20 = vld [vmem:[%s4126_s15 + $0x1a0] sm:$0xff] }
 0x5b3   :  { %3268 = vpow2.f32 %v865_v24  ;;  %v967_v27 = vsub.f32 %v963_v15, %v966_v25  ;;  %v1194_v15 = vld [vmem:[%s4126_s15 + $0x58] sm:$0xff]  ;;  %v1200_v24 = vld [vmem:[%s4126_s15 + $0x88] sm:$0xff] }
 0x5b4   :  { %v3194_v18 = vpack.c.bf16 %v1198_v16, %v1194_v15  ;;  %v1204_v25 = vld [vmem:[%s4126_s15 + $0xa8] sm:$0xff]  ;;  %v1234_v16 = vld [vmem:[%s4126_s15 + $0x198] sm:$0xff] }
 0x5b5   :  { %v968_v30 = vmul.f32 1.442695, %v967_v27  ;;  %v3196_v27 = vpack.c.bf16 %v1197_v23, %v1193_v21  ;;  %v1236_v15 = vld [vmem:[%s4126_s15 + $0x1a8] sm:$0xff]  ;;  %v1233_v23 = vld [vmem:[%s4126_s15 + $0x190] sm:$0xff] }
 0x5b6   :  { %v876_v44 = vpop.permute.xlu0 %875  ;;  %3195 = vmatprep.subr.bf16.mxu0 %v3194_v18  ;;  %v1238_v18 = vld [vmem:[%s4126_s15 + $0x1b8] sm:$0xff] }
 0x5b7   :  { %3270 = vpow2.f32 %v968_v30  ;;  %v1202_v30 = vld [vmem:[%s4126_s15 + $0x98] sm:$0xff]  ;;  %3197 = vmatpush1.bf16.msra.mxu0 %v3196_v27  ;;  %v3214_v21 = vpack.c.bf16 %v1238_v18, %v1234_v16  ;;  %v1240_v27 = vld [vmem:[%s4126_s15 + $0x1c8] sm:$0xff] }
 0x5b8   :  { %3272 = vpow2.f32 %v1070_v28  ;;  %v3166_v28 = vpack.c.bf16 %v1204_v25, %v1200_v24  ;;  %v1237_v24 = vld [vmem:[%s4126_s15 + $0x1b0] sm:$0xff] }
 0x5b9   :  { %v3267_v31 = vpop.eup %3266  ;;  %v3216_v25 = vpack.c.bf16 %v1237_v24, %v1233_v23 }
 0x5ba   :  { %v768_v32 = vsel %vm746_vm9, %v3267_v31, 0.0  ;;  %v1206_v31 = vld [vmem:[%s4126_s15 + $0xb8] sm:$0xff] }
 0x5bb   :  { %v769_v33 = vsel %vm761_vm12, %v768_v32, 0.0 }
 0x5bc   :  { %770 = vadd.xlane.f32.xlu0 %v769_v33  ;;  %v3198_v33 = vpack.c.bf16 %v1206_v31, %v1202_v30  ;;  %v1242_v30 = vld [vmem:[%s4126_s15 + $0x1d8] sm:$0xff] }
 0x5bd   :  { %v3269_v34 = vpop.eup %3268 }
 0x5be   :  { %v867_v35 = vsel %vm746_vm9, %v3269_v34, 0.0  ;;  %v1203_v34 = vld [vmem:[%s4126_s15 + $0xa0] sm:$0xff]  ;;  %3199 = vmatprep.subr.bf16.mxu0 %v3198_v33  ;;  %v1246_v33 = vld [vmem:[%s4126_s15 + $0x1f8] sm:$0xff] }
 0x5bf   :  { %v868_v36 = vsel %vm761_vm12, %v867_v35, 0.0 }
 0x5c0   :  { %869 = vadd.xlane.f32.xlu0 %v868_v36  ;;  %v1205_v36 = vld [vmem:[%s4126_s15 + $0xb0] sm:$0xff] }
 0x5c1   :  { %v3271_v37 = vpop.eup %3270 }
 0x5c2   :  { %v3273_v38 = vpop.eup %3272  ;;  %v970_v40 = vsel %vm746_vm9, %v3271_v37, 0.0 }
 0x5c3   :  { %v971_v41 = vsel %vm761_vm12, %v970_v40, 0.0  ;;  %v1072_v42 = vsel %vm746_vm9, %v3273_v38, 0.0  ;;  %v1208_v38 = vld [vmem:[%s4126_s15 + $0xc8] sm:$0xff] }
 0x5c4   :  { %972 = vadd.xlane.f32.xlu0 %v971_v41  ;;  %v1073_v43 = vsel %vm761_vm12, %v1072_v42, 0.0  ;;  %v1210_v41 = vld [vmem:[%s4126_s15 + $0xd8] sm:$0xff] }
 0x5c8   :  { %1074 = vadd.xlane.f32.xlu0 %v1073_v43 }
 0x5de   :  { %1079 = vrot.lane.b32.xlu0 %v3616_v39, %s3316_s6 }
 0x649   :  { %v771_v45 = vpop.xlane.xlu0 %770 }
 0x64a   :  { %v772_v46 = vmax.f32 %v771_v45, 1e-16  ;;  %v1207_v45 = vld [vmem:[%s4126_s15 + $0xc0] sm:$0xff] }
 0x64c   :  { %3274 = vrcp.f32 %v772_v46  ;;  %v1211_v46 = vld [vmem:[%s4126_s15 + $0xe0] sm:$0xff] }
 0x64d   :  { %v870_v48 = vpop.xlane.xlu0 %869 }
 0x64e   :  { %v871_v49 = vmax.f32 %v870_v48, 1e-16 }
 0x650   :  { %3276 = vrcp.f32 %v871_v49  ;;  %v1209_v49 = vld [vmem:[%s4126_s15 + $0xd0] sm:$0xff] }
 0x651   :  { %v973_v52 = vpop.xlane.xlu0 %972 }
 0x652   :  { %v974_v53 = vmax.f32 %v973_v52, 1e-16  ;;  %v1213_v52 = vld [vmem:[%s4126_s15 + $0xf0] sm:$0xff] }
 0x654   :  { %3278 = vrcp.f32 %v974_v53  ;;  %v1216_v53 = vld [vmem:[%s4126_s15 + $0x108] sm:$0xff] }
 0x655   :  { %v1075_v54 = vpop.xlane.xlu0 %1074 }
 0x656   :  { %v3275_v55 = vpop.eup %3274  ;;  %v1076_v56 = vmax.f32 %v1075_v54, 1e-16  ;;  %v1220_v54 = vld [vmem:[%s4126_s15 + $0x128] sm:$0xff] }
 0x657   :  { %v774_v57 = vmul.f32 %v3275_v55, %v768_v32  ;;  %v1199_v32 = vld [vmem:[%s4126_s15 + $0x80] sm:$0xff]  ;;  %v1218_v55 = vld [vmem:[%s4126_s15 + $0x118] sm:$0xff] }
 0x658   :  { %3280 = vrcp.f32 %v1076_v56  ;;  %v3168_v37 = vpack.c.bf16 %v1203_v34, %v1199_v32  ;;  %v1222_v56 = vld [vmem:[%s4126_s15 + $0x138] sm:$0xff]  ;;  %v1239_v34 = vld [vmem:[%s4126_s15 + $0x1c0] sm:$0xff] }
 0x659   :  { %2968 = vmatmul.mubr.msk.f32.vlgmr.msra.gmra.mrb[10].mxu1 %vm761_vm12, %v774_v57  ;;  %v1080_v62 = vpop.permute.xlu0 %1079  ;;  %v3172_v57 = vpack.c.bf16 %v1211_v46, %v1207_v45 }
 0x65a   :  { %v3277_v58 = vpop.eup %3276  ;;  %2971 = vmatpush3.msra.mxu1 %v876_v44  ;;  %2972 = vmatprep.mubr.msk.f32.mxu1 %vm3308_vm5, %v3309_v29  ;;  %v1214_v44 = vld [vmem:[%s4126_s15 + $0xf8] sm:$0xff] }
 0x65b   :  { %2975 = vmatprep.subr.mxu1 %v3309_v29  ;;  %v873_v39 = vmul.f32 %v3277_v58, %v867_v35  ;;  %v1201_v35 = vld [vmem:[%s4126_s15 + $0x90] sm:$0xff]  ;;  %v3202_v48 = vpack.c.bf16 %v1214_v44, %v1210_v41  ;;  %v3204_v58 = vpack.c.bf16 %v1213_v52, %v1209_v49 }
 0x65c   :  { %v1245_v41 = vld [vmem:[%s4126_s15 + $0x1f0] sm:$0xff] }
 0x65d   :  { %2973 = vmatmul.mubr.msk.f32.vlgmr.msra.gmra.mrb[12].mxu1 %vm761_vm12, %v873_v39  ;;  %v3174_v39 = vpack.c.bf16 %v1220_v54, %v1216_v53 }
 0x65e   :  { %v3279_v60 = vpop.eup %3278  ;;  %2976 = vmatpush3.msra.mxu1 %v978_v59  ;;  %2977 = vmatprep.mubr.msk.f32.mxu1 %vm3308_vm5, %v3309_v29  ;;  %v1215_v59 = vld [vmem:[%s4126_s15 + $0x100] sm:$0xff] }
 0x65f   :  { %2980 = vmatprep.subr.mxu1 %v3309_v29  ;;  %v976_v61 = vmul.f32 %v3279_v60, %v970_v40  ;;  %v1212_v40 = vld [vmem:[%s4126_s15 + $0xe8] sm:$0xff]  ;;  %v1219_v60 = vld [vmem:[%s4126_s15 + $0x120] sm:$0xff] }
 0x660   :  { %v3170_v43 = vpack.c.bf16 %v1212_v40, %v1208_v38  ;;  %v1241_v40 = vld [vmem:[%s4126_s15 + $0x1d0] sm:$0xff] }
 0x661   :  { %2978 = vmatmul.mubr.msk.f32.vlgmr.msra.gmra.mrb[14].mxu1 %vm761_vm12, %v976_v61  ;;  %v3206_v61 = vpack.c.bf16 %v1222_v56, %v1218_v55  ;;  %v2727_v55 = vld [vmem:[%s4127_s13] ss:$0 sm:$0xff] }
 0x662   :  { %v3281_v63 = vpop.eup %3280  ;;  %2981 = vmatpush3.msra.mxu1 %v1080_v62  ;;  %2982 = vmatprep.mubr.msk.f32.mxu1 %vm3308_vm5, %v3309_v29  ;;  %v1217_v62 = vld [vmem:[%s4126_s15 + $0x110] sm:$0xff] }
 0x663   :  { %v1078_v0 = vmul.f32 %v3281_v63, %v1072_v42  ;;  %3159 = vmatprep.subr.bf16.mxu1 %v3158_v4  ;;  %v3200_v42 = vpack.c.bf16 %v1205_v36, %v1201_v35  ;;  %v1221_v63 = vld [vmem:[%s4126_s15 + $0x130] sm:$0xff]  ;;  %v1226_v4 = vld [vmem:[%s4126_s15 + $0x158] sm:$0xff]  ;;  %v1243_v35 = vld [vmem:[%s4126_s15 + $0x1e0] sm:$0xff] }
 0x664   :  { %v3208_v1 = vpack.c.bf16 %v1221_v63, %v1217_v62  ;;  %v3188_v38 = vpack.c.bf16 %v1243_v35, %v1239_v34 }
 0x665   :  { %2983 = vmatmul.mubr.msk.f32.vlgmr.msra.gmra.mrb[16].mxu1 %vm761_vm12, %v1078_v0  ;;  %3201 = vmatpush1.bf16.msra.mxu0 %v3200_v42  ;;  %v3176_v0 = vpack.c.bf16 %v1219_v60, %v1215_v59  ;;  %v3220_v42 = vpack.c.bf16 %v1245_v41, %v1241_v40  ;;  %v1255_v60 = vsub.s32 1, %v3622_v47 }
 0x666   :  { %1333 = vmatprep.mubr.f32.mxu1 %v3309_v29  ;;  %3161 = vmatpush1.bf16.msra.mxu1 %v3160_v9  ;;  %v3210_v9 = vpack.c.bf16 %v1230_v6, %v1226_v4 }
 0x667   :  { %3163 = vmatprep.subr.bf16.mxu1 %v3162_v17  ;;  %3203 = vmatprep.subr.bf16.mxu0 %v3202_v48  ;;  %v3182_v17 = vpack.c.bf16 %v1236_v15, %v1232_v14 }
 0x669   :  { %3205 = vmatpush1.bf16.msra.mxu0 %v3204_v58 }
 0x66a   :  { %3165 = vmatpush1.bf16.msra.mxu1 %v3164_v22  ;;  %3207 = vmatprep.subr.bf16.mxu0 %v3206_v61  ;;  %v3184_v22 = vpack.c.bf16 %v1235_v20, %v1231_v19  ;;  %v3892_v61 = vld [vmem:[%s4128_s16] sm:$0xf] }
 0x66b   :  { %3167 = vmatprep.subr.bf16.mxu1 %v3166_v28  ;;  %v1244_v28 = vld [vmem:[%s4126_s15 + $0x1e8] sm:$0xff]  ;;  %v1256_v62 = vrot.slane %v3892_v61, %v1255_v60  ;;  %v1260_v4 = vrot.slane %v3892_v61, %v854_v51 }
 0x66c   :  { %v3186_v32 = vpack.c.bf16 %v1244_v28, %v1240_v27 }
 0x66d   :  { %3209 = vmatpush1.bf16.msra.mxu0 %v3208_v1  ;;  %v1252_v1 = vrot.slane %v3892_v61, %v754_v50  ;;  %v3915_v50 = vld [vmem:[%s4129_s19] sm:$0xff] }
 0x66e   :  { %3169 = vmatpush1.bf16.msra.mxu1 %v3168_v37  ;;  %3211 = vmatprep.subr.bf16.mxu0 %v3210_v9  ;;  %v3218_v37 = vpack.c.bf16 %v1246_v33, %v1242_v30  ;;  %vm1182_vm1 = vcmp.gt.f32.partialorder %v3915_v50, 0.0 }
 0x66f   :  { %3171 = vmatprep.subr.bf16.mxu1 %v3170_v43 }
 0x671   :  { %3213 = vmatpush1.bf16.msra.mxu0 %v3212_v13 }
 0x672   :  { %3173 = vmatpush1.bf16.msra.mxu1 %v3172_v57  ;;  %3215 = vmatprep.subr.bf16.mxu0 %v3214_v21 }
 0x673   :  { %3175 = vmatprep.subr.bf16.mxu1 %v3174_v39 }
 0x675   :  { %3217 = vmatpush1.bf16.msra.mxu0 %v3216_v25 }
 0x676   :  { %3177 = vmatpush1.bf16.msra.mxu1 %v3176_v0  ;;  %3219 = vmatprep.subr.bf16.mxu0 %v3218_v37 }
 0x677   :  { %3179 = vmatprep.subr.bf16.mxu1 %v3178_v5 }
 0x679   :  { %3221 = vmatpush1.bf16.msra.mxu0 %v3220_v42 }
 0x67a   :  { %3181 = vmatpush1.bf16.msra.mxu1 %v3180_v10  ;;  %3000 = vmatprep.subr.mxu0 %v3309_v29 }
 0x67b   :  { %3183 = vmatprep.subr.bf16.mxu1 %v3182_v17 }
 0x67e   :  { %3185 = vmatpush1.bf16.msra.mxu1 %v3184_v22 }
 0x67f   :  { %3187 = vmatprep.subr.bf16.mxu1 %v3186_v32 }
 0x682   :  { %3189 = vmatpush1.bf16.msra.mxu1 %v3188_v38 }
 0x683   :  { %2985 = vmatprep.subr.mxu1 %v3309_v29 }
 0x72c   :  { %v844_v31 = vpop.f32.mrb[10].mxu1 }
 0x72d   :  { %v2969_v36 = vpop.f32.mrb[11].mxu1 }
 0x730   :  { %v947_v43 = vpop.f32.mrb[12].mxu1 }
 0x731   :  { %1156 = vrot.lane.b32.xlu0 %v947_v43, %s3316_s6  ;;  %v2974_v44 = vpop.f32.mrb[13].mxu1 }
 0x734   :  { %v1049_v45 = vpop.f32.mrb[14].mxu1 }
 0x735   :  { %1160 = vrot.lane.b32.xlu0 %v1049_v45, %s3314_s12  ;;  %v2979_v46 = vpop.f32.mrb[15].mxu1 }
 0x738   :  { %v1151_v48 = vpop.f32.mrb[16].mxu1 }
 0x739   :  { %1164 = vrot.lane.b32.xlu0 %v1151_v48, %s3315_s14  ;;  %v2984_v49 = vpop.f32.mrb[17].mxu1 }
 0x7a3   :  { %v1157_v52 = vpop.permute.xlu0 %1156 }
 0x7a4   :  { %v1167_v54 = vsel %vm196_vm4, %v844_v31, %v1157_v52 }
 0x7a7   :  { %v1161_v53 = vpop.permute.xlu0 %1160 }
 0x7a8   :  { %v1169_v56 = vsel %vm1168_vm15, %v1167_v54, %v1161_v53 }
 0x7ab   :  { %v1165_v57 = vpop.permute.xlu0 %1164 }
 0x7ac   :  { %v1171_v58 = vsel %vm1170_vm0, %v1169_v56, %v1165_v57 }
 0x7ad   :  { %v1179_v39 = vadd.f32 %v2727_v55, %v1171_v58 }
 0x7af   :  { %v1180_v59 = vmax.f32 %v1179_v39, 0.0 }
 0x7b1   :  { %1334 = vmatmul.mubr.f32.vlgmr.msra.gmra.mrb[18].mxu1 %v1180_v59  ;;  %1405 = vmatmul.mubr.f32.vlgmr.msra.gmra.mrb[8].mxu0 %v1180_v59 }
 0x7b2   :  { %2987 = vmatprep.mubr.msk.f32.mxu1 %vm3308_vm5, %v3309_v29  ;;  %3002 = vmatprep.mubr.msk.f32.mxu0 %vm3308_vm5, %v3309_v29 }
 0x884   :  { %v1335_v63 = vpop.f32.mrb[18].mxu1  ;;  %v1406_v0 = vpop.f32.mrb[8].mxu0 }
 0x885   :  { %v1337_v2 = vpop.f32.mrb[19].mxu1  ;;  %v3898_v3 = vpop.f32.mrb[9].mxu0  ;;  %v1336_v6 = vadd.f32 %v1335_v63, %v1252_v1  ;;  %v3905_v7 = vadd.f32 %v1406_v0, %v1260_v4 }
 0x886   :  { %v1338_v5 = vadd.f32 %v1337_v2, %v1256_v62 }
 0x888   :  { %2986 = vmatpush3.xpose.msk.msra.mxu1 %vm196_vm4, %v1338_v5 }
 0x889   :  { %2990 = vmatprep.subr.mxu1 %v3309_v29 }
 0x88b   :  { %2988 = vmatmul.mubr.msk.f32.vlgmr.msra.gmra.mrb[20].mxu1 %vm196_vm4, %v1336_v6 }
 0x88c   :  { %2991 = vmatpush3.msra.mxu1 %v3905_v7  ;;  %2992 = vmatprep.mubr.msk.f32.mxu1 %vm3308_vm5, %v3309_v29 }
 0x88d   :  { %2995 = vmatprep.subr.mxu1 %v3309_v29 }
 0x95e   :  { %v1483_v51 = vpop.f32.mrb[20].mxu1 }
 0x95f   :  { %v1487_v8 = vmul.f32 0.17677669, %v1483_v51  ;;  %v2989_v9 = vpop.f32.mrb[21].mxu1  ;;  %v1263_v51 = vsub.s32 3, %v3622_v47 }
 0x961   :  { %v1488_v10 = vsel %vm1182_vm1, %v1487_v8, -1e+30  ;;  %v1264_v8 = vrot.slane %v3892_v61, %v1263_v51  ;;  %v2740_v51 = vld [vmem:[%s4131_s18] ss:$0 sm:$0xff]  ;;  %s3317_s18 = smov 112  }
 0x962   :  { %v1489_v11 = vsel %vm761_vm12, %v1488_v10, -inf }
 0x963   :  { %1490 = vmax.xlane.f32.xlu0 %v1489_v11  ;;  %v3976_v9 = vadd.f32 %v3898_v3, %v1264_v8 }
 0x979   :  { %1577 = vrot.lane.b32.xlu0 %v1338_v5, %s3315_s14 }
 0x97d   :  { %1751 = vrot.lane.b32.xlu0 %v1338_v5, %s3314_s12 }
 0x981   :  { %1923 = vrot.lane.b32.xlu0 %v1338_v5, %s3316_s6 }
 0x9f0   :  { %v1491_v12 = vpop.xlane.xlu0 %1490 }
 0x9f1   :  { %v1492_v13 = vsub.f32 %v1488_v10, %v1491_v12 }
 0x9f3   :  { %v1493_v14 = vmul.f32 1.442695, %v1492_v13 }
 0x9f4   :  { %v1578_v20 = vpop.permute.xlu0 %1577 }
 0x9f5   :  { %3282 = vpow2.f32 %v1493_v14 }
 0x9f8   :  { %v1752_v24 = vpop.permute.xlu0 %1751 }
 0x9fc   :  { %v1924_v27 = vpop.permute.xlu0 %1923 }
 0x9ff   :  { %v3283_v15 = vpop.eup %3282 }
 0xa00   :  { %v1495_v16 = vsel %vm1182_vm1, %v3283_v15, 0.0 }
 0xa01   :  { %v1496_v17 = vsel %vm761_vm12, %v1495_v16, 0.0 }
 0xa02   :  { %1497 = vadd.xlane.f32.xlu1 %v1496_v17 }
 0xa13   :  { %1575 = vrot.lane.b32.xlu1 %v1336_v6, %s3315_s14 }
 0xa17   :  { %1749 = vrot.lane.b32.xlu1 %v1336_v6, %s3314_s12 }
 0xa1b   :  { %1921 = vrot.lane.b32.xlu1 %v1336_v6, %s3316_s6 }
 0xa8f   :  { %v1498_v18 = vpop.xlane.xlu1 %1497 }
 0xa90   :  { %v1499_v19 = vmax.f32 %v1498_v18, 1e-16 }
 0xa92   :  { %3284 = vrcp.f32 %v1499_v19 }
 0xa93   :  { %v1576_v23 = vpop.permute.xlu1 %1575 }
 0xa97   :  { %v1750_v25 = vpop.permute.xlu1 %1749 }
 0xa9b   :  { %v1922_v28 = vpop.permute.xlu1 %1921 }
 0xa9c   :  { %v3285_v21 = vpop.eup %3284 }
 0xa9d   :  { %v1501_v22 = vmul.f32 %v3285_v21, %v1495_v16  ;;  %v2110_v21 = vld [vmem:[%s4130_s17 + $0x8] sm:$0xff] }
 0xa9f   :  { %2993 = vmatmul.mubr.msk.f32.vlgmr.msra.gmra.mrb[22].mxu1 %vm761_vm12, %v1501_v22  ;;  %v2111_v22 = vld [vmem:[%s4130_s17 + $0x10] sm:$0xff] }
 0xaa0   :  { %2996 = vmatpush3.xpose.msk.msra.mxu1 %vm196_vm4, %v1578_v20  ;;  %2997 = vmatprep.mubr.msk.f32.mxu1 %vm3308_vm5, %v3309_v29  ;;  %v2109_v20 = vld [vmem:[%s4130_s17] sm:$0xff] }
 0xaa1   :  { %3005 = vmatprep.subr.mxu1 %v3309_v29 }
 0xaa3   :  { %2998 = vmatmul.mubr.msk.f32.vlgmr.msra.gmra.mrb[24].mxu1 %vm196_vm4, %v1576_v23  ;;  %v3223_v23 = vpack.c.bf16 %v2110_v21, %v2109_v20 }
 0xaa4   :  { %3006 = vmatpush3.xpose.msk.msra.mxu1 %vm196_vm4, %v1752_v24  ;;  %3007 = vmatprep.mubr.msk.f32.mxu1 %vm3308_vm5, %v3309_v29  ;;  %v2112_v24 = vld [vmem:[%s4130_s17 + $0x18] sm:$0xff] }
 0xaa5   :  { %3015 = vmatprep.subr.mxu1 %v3309_v29 }
 0xaa7   :  { %3008 = vmatmul.mubr.msk.f32.vlgmr.msra.gmra.mrb[26].mxu1 %vm196_vm4, %v1750_v25  ;;  %v3226_v25 = vpack.c.bf16 %v2112_v24, %v2111_v22 }
 0xaa8   :  { %3016 = vmatpush3.xpose.msk.msra.mxu1 %vm196_vm4, %v1924_v27  ;;  %3017 = vmatprep.mubr.msk.f32.mxu1 %vm3308_vm5, %v3309_v29  ;;  %v2113_v27 = vld [vmem:[%s4130_s17 + $0x20] sm:$0xff] }
 0xaa9   :  { %3222 = vmatprep.subr.bf16.mxu1 %v3307_v26 }
 0xaab   :  { %3018 = vmatmul.mubr.msk.f32.vlgmr.msra.gmra.mrb[28].mxu1 %vm196_vm4, %v1922_v28  ;;  %v2114_v28 = vld [vmem:[%s4130_s17 + $0x28] sm:$0xff] }
 0xaac   :  { %3057 = vmatprep.mubr.msk.f32.mxu1 %vm3308_vm5, %v3309_v29  ;;  %3224 = vmatpush3.bf16.msra.mxu1 %v3223_v23 }
 0xaad   :  { %3225 = vmatprep.subr.bf16.mxu1 %v3307_v26 }
 0xab0   :  { %3227 = vmatpush3.bf16.msra.mxu1 %v3226_v25 }
 0xab1   :  { %3228 = vmatprep.subr.bf16.mxu1 %v3307_v26 }
 0xb72   :  { %v3948_v30 = vpop.f32.mrb[22].mxu1 }
 0xb73   :  { %v2994_v31 = vpop.f32.mrb[23].mxu1 }
 0xb74   :  { %v3229_v31 = vpack.c.bf16 %v2114_v28, %v2113_v27 }
 0xb76   :  { %v1649_v32 = vpop.f32.mrb[24].mxu1  ;;  %3230 = vmatpush3.bf16.msra.mxu1 %v3229_v31 }
 0xb77   :  { %v1653_v33 = vmul.f32 0.17677669, %v1649_v32  ;;  %v2999_v34 = vpop.f32.mrb[25].mxu1  ;;  %v2115_v32 = vld [vmem:[%s4130_s17 + $0x30] sm:$0xff]  ;;  %3231 = vmatprep.subr.bf16.mxu1 %v3307_v26 }
 0xb79   :  { %v1654_v35 = vsel %vm1182_vm1, %v1653_v33, -1e+30  ;;  %v2116_v33 = vld [vmem:[%s4130_s17 + $0x38] sm:$0xff] }
 0xb7a   :  { %v1823_v36 = vpop.f32.mrb[26].mxu1  ;;  %v1655_v37 = vsel %vm761_vm12, %v1654_v35, -inf  ;;  %v3232_v34 = vpack.c.bf16 %v2116_v33, %v2115_v32 }
 0xb7b   :  { %v1827_v38 = vmul.f32 0.17677669, %v1823_v36  ;;  %1656 = vmax.xlane.f32.xlu0 %v1655_v37  ;;  %v3009_v40 = vpop.f32.mrb[27].mxu1  ;;  %v2118_v36 = vld [vmem:[%s4130_s17 + $0x48] sm:$0xff] }
 0xb7c   :  { %3233 = vmatpush3.bf16.msra.mxu1 %v3232_v34  ;;  %v2120_v40 = vld [vmem:[%s4130_s17 + $0x58] sm:$0xff] }
 0xb7d   :  { %v1828_v41 = vsel %vm1182_vm1, %v1827_v38, -1e+30  ;;  %3234 = vmatprep.subr.bf16.mxu1 %v3307_v26  ;;  %v2119_v38 = vld [vmem:[%s4130_s17 + $0x50] sm:$0xff] }
 0xb7e   :  { %v1995_v42 = vpop.f32.mrb[28].mxu1  ;;  %v1829_v43 = vsel %vm761_vm12, %v1828_v41, -inf }
 0xb7f   :  { %v1999_v44 = vmul.f32 0.17677669, %v1995_v42  ;;  %1830 = vmax.xlane.f32.xlu1 %v1829_v43  ;;  %v3019_v45 = vpop.f32.mrb[29].mxu1  ;;  %v2121_v42 = vld [vmem:[%s4130_s17 + $0x60] sm:$0xff]  ;;  %v2122_v43 = vld [vmem:[%s4130_s17 + $0x68] sm:$0xff] }
 0xb80   :  { %v2123_v45 = vld [vmem:[%s4130_s17 + $0x70] sm:$0xff] }
 0xb81   :  { %v2000_v46 = vsel %vm1182_vm1, %v1999_v44, -1e+30  ;;  %v3241_v44 = vpack.c.bf16 %v2122_v43, %v2121_v42 }
 0xb82   :  { %v2001_v48 = vsel %vm761_vm12, %v2000_v46, -inf }
 0xb83   :  { %2002 = vmax.xlane.f32.xlu0 %v2001_v48 }
 0xb90   :  { %1669 = vrot.lane.b32.xlu1 %v3905_v7, %s3315_s14 }
 0xc08   :  { %v1657_v49 = vpop.xlane.xlu0 %1656 }
 0xc09   :  { %v1658_v52 = vsub.f32 %v1654_v35, %v1657_v49  ;;  %v2117_v35 = vld [vmem:[%s4130_s17 + $0x40] sm:$0xff] }
 0xc0a   :  { %v3235_v37 = vpack.c.bf16 %v2118_v36, %v2117_v35 }
 0xc0b   :  { %v1659_v53 = vmul.f32 1.442695, %v1658_v52 }
 0xc0c   :  { %v1831_v54 = vpop.xlane.xlu1 %1830  ;;  %3236 = vmatpush3.bf16.msra.mxu1 %v3235_v37 }
 0xc0d   :  { %3286 = vpow2.f32 %v1659_v53  ;;  %v1832_v55 = vsub.f32 %v1828_v41, %v1831_v54  ;;  %3237 = vmatprep.subr.bf16.mxu1 %v3307_v26  ;;  %v3238_v41 = vpack.c.bf16 %v2120_v40, %v2119_v38 }
 0xc0f   :  { %v1833_v56 = vmul.f32 1.442695, %v1832_v55 }
 0xc10   :  { %v1670_v57 = vpop.permute.xlu1 %1669  ;;  %v2003_v58 = vpop.xlane.xlu0 %2002  ;;  %3239 = vmatpush3.bf16.msra.mxu1 %v3238_v41 }
 0xc11   :  { %3288 = vpow2.f32 %v1833_v56  ;;  %v2004_v39 = vsub.f32 %v2000_v46, %v2003_v58  ;;  %3001 = vmatpush3.msra.mxu0 %v1670_v57  ;;  %3240 = vmatprep.subr.bf16.mxu1 %v3307_v26  ;;  %v2124_v46 = vld [vmem:[%s4130_s17 + $0x78] sm:$0xff] }
 0xc12   :  { %3010 = vmatprep.subr.mxu0 %v3309_v29  ;;  %v3244_v48 = vpack.c.bf16 %v2124_v46, %v2123_v45 }
 0xc13   :  { %v2005_v59 = vmul.f32 1.442695, %v2004_v39 }
 0xc14   :  { %3242 = vmatpush3.bf16.msra.mxu1 %v3241_v44 }
 0xc15   :  { %3290 = vpow2.f32 %v2005_v59  ;;  %3243 = vmatprep.subr.bf16.mxu1 %v3307_v26 }
 0xc17   :  { %v3287_v60 = vpop.eup %3286 }
 0xc18   :  { %v1661_v62 = vsel %vm1182_vm1, %v3287_v60, 0.0  ;;  %3245 = vmatpush3.bf16.msra.mxu1 %v3244_v48 }
 0xc19   :  { %v1662_v63 = vsel %vm761_vm12, %v1661_v62, 0.0 }
 0xc1a   :  { %1663 = vadd.xlane.f32.xlu0 %v1662_v63  ;;  %v1572_v63 = vadd.f32 %v3948_v30, %v3976_v9 }
 0xc1b   :  { %v3289_v0 = vpop.eup %3288 }
 0xc1c   :  { %v1835_v1 = vsel %vm1182_vm1, %v3289_v0, 0.0 }
 0xc1d   :  { %v1836_v2 = vsel %vm761_vm12, %v1835_v1, 0.0 }
 0xc1e   :  { %1837 = vadd.xlane.f32.xlu1 %v1836_v2 }
 0xc1f   :  { %v3291_v4 = vpop.eup %3290 }
 0xc20   :  { %v2007_v5 = vsel %vm1182_vm1, %v3291_v4, 0.0 }
 0xc21   :  { %v2008_v6 = vsel %vm761_vm12, %v2007_v5, 0.0 }
 0xc22   :  { %2009 = vadd.xlane.f32.xlu0 %v2008_v6 }
 0xc2f   :  { %2014 = vrot.lane.b32.xlu1 %v3905_v7, %s3316_s6 }
 0xc33   :  { %1673 = vrot.lane.b32.xlu1 %v3976_v9, %s3315_s14 }
 0xc37   :  { %2017 = vrot.lane.b32.xlu1 %v3976_v9, %s3316_s6 }
 0xc38   :  { %1842 = vrot.lane.b32.xlu0 %v3905_v7, %s3314_s12 }
 0xc3c   :  { %1845 = vrot.lane.b32.xlu0 %v3976_v9, %s3314_s12 }
 0xca7   :  { %v1664_v47 = vpop.xlane.xlu0 %1663 }
 0xca8   :  { %v1665_v61 = vmax.f32 %v1664_v47, 1e-16 }
 0xcaa   :  { %3292 = vrcp.f32 %v1665_v61 }
 0xcab   :  { %v1838_v10 = vpop.xlane.xlu1 %1837 }
 0xcac   :  { %v1839_v11 = vmax.f32 %v1838_v10, 1e-16 }
 0xcae   :  { %3294 = vrcp.f32 %v1839_v11 }
 0xcaf   :  { %v2010_v3 = vpop.xlane.xlu0 %2009  ;;  %v2015_v17 = vpop.permute.xlu1 %2014 }
 0xcb0   :  { %v2011_v12 = vmax.f32 %v2010_v3, 1e-16 }
 0xcb2   :  { %3296 = vrcp.f32 %v2011_v12 }
 0xcb3   :  { %v1843_v15 = vpop.permute.xlu0 %1842  ;;  %v1674_v49 = vpop.permute.xlu1 %1673 }
 0xcb4   :  { %v3293_v13 = vpop.eup %3292 }
 0xcb5   :  { %v1667_v14 = vmul.f32 %v3293_v13, %v1661_v62 }
 0xcb7   :  { %3003 = vmatmul.mubr.msk.f32.vlgmr.msra.gmra.mrb[10].mxu0 %vm761_vm12, %v1667_v14  ;;  %v1846_v55 = vpop.permute.xlu0 %1845  ;;  %v2018_v58 = vpop.permute.xlu1 %2017 }
 0xcb8   :  { %v3295_v16 = vpop.eup %3294  ;;  %3011 = vmatpush3.msra.mxu0 %v1843_v15  ;;  %3012 = vmatprep.mubr.msk.f32.mxu0 %vm3308_vm5, %v3309_v29 }
 0xcb9   :  { %3020 = vmatprep.subr.mxu0 %v3309_v29  ;;  %v1841_v7 = vmul.f32 %v3295_v16, %v1835_v1 }
 0xcbb   :  { %3013 = vmatmul.mubr.msk.f32.vlgmr.msra.gmra.mrb[12].mxu0 %vm761_vm12, %v1841_v7 }
 0xcbc   :  { %v3297_v18 = vpop.eup %3296  ;;  %3021 = vmatpush3.msra.mxu0 %v2015_v17  ;;  %3022 = vmatprep.mubr.msk.f32.mxu0 %vm3308_vm5, %v3309_v29 }
 0xcbd   :  { %v2013_v19 = vmul.f32 %v3297_v18, %v2007_v5  ;;  %3060 = vmatprep.subr.mxu0 %v3309_v29 }
 0xcbf   :  { %3023 = vmatmul.mubr.msk.f32.vlgmr.msra.gmra.mrb[14].mxu0 %vm761_vm12, %v2013_v19 }
 0xcc0   :  { %3062 = vmatprep.mubr.msk.f32.mxu0 %vm3308_vm5, %v3309_v29 }
 0xd8a   :  { %v1745_v52 = vpop.f32.mrb[10].mxu0 }
 0xd8b   :  { %v1746_v53 = vadd.f32 %v1745_v52, %v1674_v49  ;;  %v3004_v54 = vpop.f32.mrb[11].mxu0 }
 0xd8d   :  { %2094 = vrot.lane.b32.xlu0 %v1746_v53, %s3316_s6 }
 0xd8e   :  { %v1917_v56 = vpop.f32.mrb[12].mxu0 }
 0xd8f   :  { %v1918_v57 = vadd.f32 %v1917_v56, %v1846_v55  ;;  %v3014_v26 = vpop.f32.mrb[13].mxu0  ;;  %v2550_v56 = vld [vmem:[%s4132_s20] sm:$0xff] }
 0xd90   :  { %v2624_v26 = vld [vmem:[%s4133_s21] sm:$0xff] }
 0xd91   :  { %2098 = vrot.lane.b32.xlu1 %v1918_v57, %s3314_s12 }
 0xd92   :  { %v2089_v39 = vpop.f32.mrb[14].mxu0 }
 0xd93   :  { %v2090_v59 = vadd.f32 %v2089_v39, %v2018_v58  ;;  %v3024_v60 = vpop.f32.mrb[15].mxu0 }
 0xd95   :  { %2102 = vrot.lane.b32.xlu0 %v2090_v59, %s3315_s14 }
 0xdff   :  { %v2095_v62 = vpop.permute.xlu0 %2094 }
 0xe00   :  { %v2105_v1 = vsel %vm196_vm4, %v1572_v63, %v2095_v62 }
 0xe03   :  { %v2099_v0 = vpop.permute.xlu1 %2098 }
 0xe04   :  { %v2106_v2 = vsel %vm1168_vm15, %v2105_v1, %v2099_v0 }
 0xe07   :  { %v2103_v4 = vpop.permute.xlu0 %2102 }
 0xe08   :  { %v2107_v5 = vsel %vm1170_vm0, %v2106_v2, %v2103_v4 }
 0xe09   :  { %v2108_v6 = vmax.f32 %v2107_v5, 0.0 }
 0xe0b   :  { %3058 = vmatmul.mubr.f32.vlgmr.msra.gmra.mrb[30].mxu1 %v2108_v6 }
 0xede   :  { %v2198_v8 = vpop.f32.mrb[30].mxu1 }
 0xedf   :  { %v2199_v47 = vadd.f32 %v2740_v51, %v2198_v8  ;;  %v3059_v61 = vpop.f32.mrb[31].mxu1 }
 0xee1   :  { %2203 = vrot.lane.b32.xlu1 %v2199_v47, %s3315_s14  ;;  %s3318_s14 = smov 80  }
 0xf53   :  { %v2204_v30 = vpop.permute.xlu1 %2203 }
 0xf54   :  { %3061 = vmatpush3.xpose.msk.msra.mxu0 %vm382_vm7, %v2204_v30 }
 0xf55   :  { %3065 = vmatprep.subr.mxu0 %v3309_v29 }
 0xf57   :  { %3063 = vmatmul.mubr.msk.f32.vlgmr.msra.gmra.mrb[16].mxu0 %vm382_vm7, %v2199_v47 }
 0xf58   :  { %3067 = vmatprep.mubr.msk.f32.mxu0 %vm3308_vm5, %v3309_v29 }
0x102a   :  { %v2275_v9 = vpop.f32.mrb[16].mxu0 }
0x102b   :  { %v2279_v10 = vmul.f32 0.25, %v2275_v9  ;;  %v3064_v11 = vpop.f32.mrb[17].mxu0 }
0x102d   :  { %v2280_v3 = vsel %vm1182_vm1, %v2279_v10, -1e+30 }
0x102e   :  { %v2281_v12 = vsel %vm761_vm12, %v2280_v3, -inf }
0x102f   :  { %2282 = vmax.xlane.f32.xlu0 %v2281_v12 }
0x1045   :  { %2294 = vrot.lane.b32.xlu0 %v2199_v47, %s3314_s12  ;;  %s3319_s12 = smov 16  }
0x1049   :  { %2373 = vrot.lane.b32.xlu0 %v2199_v47, %s3317_s18 }
0x10bc   :  { %v2283_v13 = vpop.xlane.xlu0 %2282 }
0x10bd   :  { %v2284_v14 = vsub.f32 %v2280_v3, %v2283_v13 }
0x10bf   :  { %v2285_v15 = vmul.f32 1.442695, %v2284_v14 }
0x10c0   :  { %v2295_v16 = vpop.permute.xlu0 %2294 }
0x10c1   :  { %3298 = vpow2.f32 %v2285_v15  ;;  %3066 = vmatpush3.msra.mxu0 %v2295_v16 }
0x10c2   :  { %3070 = vmatprep.subr.mxu0 %v3309_v29 }
0x10c4   :  { %v2374_v24 = vpop.permute.xlu0 %2373 }
0x10cb   :  { %v3299_v7 = vpop.eup %3298 }
0x10cc   :  { %v2287_v17 = vsel %vm1182_vm1, %v3299_v7, 0.0 }
0x10cd   :  { %v2288_v18 = vsel %vm761_vm12, %v2287_v17, 0.0 }
0x10ce   :  { %2289 = vadd.xlane.f32.xlu1 %v2288_v18 }
0x10df   :  { %2375 = vrot.lane.b32.xlu1 %v2199_v47, %s3318_s14 }
0x115b   :  { %v2290_v19 = vpop.xlane.xlu1 %2289 }
0x115c   :  { %v2291_v20 = vmax.f32 %v2290_v19, 1e-16 }
0x115e   :  { %3300 = vrcp.f32 %v2291_v20 }
0x115f   :  { %v2376_v23 = vpop.permute.xlu1 %2375 }
0x1168   :  { %v3301_v21 = vpop.eup %3300 }
0x1169   :  { %v2293_v22 = vmul.f32 %v3301_v21, %v2287_v17 }
0x116b   :  { %3068 = vmatmul.mubr.msk.f32.vlgmr.msra.gmra.mrb[18].mxu0 %vm761_vm12, %v2293_v22 }
0x116c   :  { %3071 = vmatpush3.xpose.msk.msra.mxu0 %vm382_vm7, %v2376_v23  ;;  %3072 = vmatprep.mubr.msk.f32.mxu0 %vm3308_vm5, %v3309_v29 }
0x116d   :  { %3075 = vmatprep.subr.mxu0 %v3309_v29 }
0x116f   :  { %3073 = vmatmul.mubr.msk.f32.vlgmr.msra.gmra.mrb[20].mxu0 %vm382_vm7, %v2374_v24 }
0x1170   :  { %3077 = vmatprep.mubr.msk.f32.mxu0 %vm3308_vm5, %v3309_v29 }
0x123e   :  { %v2369_v25 = vpop.f32.mrb[18].mxu0 }
0x123f   :  { %v3069_v27 = vpop.f32.mrb[19].mxu0 }
0x1242   :  { %v2447_v28 = vpop.f32.mrb[20].mxu0 }
0x1243   :  { %v2451_v31 = vmul.f32 0.25, %v2447_v28  ;;  %v3074_v32 = vpop.f32.mrb[21].mxu0 }
0x1245   :  { %v2452_v33 = vsel %vm1182_vm1, %v2451_v31, -1e+30 }
0x1246   :  { %v2453_v34 = vsel %vm761_vm12, %v2452_v33, -inf }
0x1247   :  { %2454 = vmax.xlane.f32.xlu1 %v2453_v34 }
0x1258   :  { %2469 = vrot.lane.b32.xlu1 %v2199_v47, %s3319_s12 }
0x125c   :  { %2297 = vrot.lane.b32.xlu1 %v2199_v47, %s3316_s6 }
0x12d4   :  { %v2455_v35 = vpop.xlane.xlu1 %2454 }
0x12d5   :  { %v2456_v36 = vsub.f32 %v2452_v33, %v2455_v35 }
0x12d7   :  { %v2457_v37 = vmul.f32 1.442695, %v2456_v36 }
0x12d8   :  { %v2470_v50 = vpop.permute.xlu1 %2469 }
0x12d9   :  { %3302 = vpow2.f32 %v2457_v37 }
0x12dc   :  { %v2298_v53 = vpop.permute.xlu1 %2297 }
0x12dd   :  { %v2370_v54 = vadd.f32 %v2369_v25, %v2298_v53 }
0x12e3   :  { %v3303_v38 = vpop.eup %3302 }
0x12e4   :  { %v2459_v40 = vsel %vm1182_vm1, %v3303_v38, 0.0 }
0x12e5   :  { %v2460_v41 = vsel %vm761_vm12, %v2459_v40, 0.0 }
0x12e6   :  { %2461 = vadd.xlane.f32.xlu0 %v2460_v41 }
0x12fc   :  { %2466 = vrot.lane.b32.xlu0 %v2199_v47, %s3320_s11 }
0x1373   :  { %v2462_v42 = vpop.xlane.xlu0 %2461 }
0x1374   :  { %v2463_v43 = vmax.f32 %v2462_v42, 1e-16 }
0x1376   :  { %3304 = vrcp.f32 %v2463_v43 }
0x1377   :  { %v2467_v44 = vpop.permute.xlu0 %2466 }
0x1378   :  { %3076 = vmatpush3.msra.mxu0 %v2467_v44 }
0x1379   :  { %3080 = vmatprep.subr.mxu0 %v3309_v29 }
0x1380   :  { %v3305_v45 = vpop.eup %3304 }
0x1381   :  { %v2465_v46 = vmul.f32 %v3305_v45, %v2459_v40 }
0x1383   :  { %3078 = vmatmul.mubr.msk.f32.vlgmr.msra.gmra.mrb[22].mxu0 %vm761_vm12, %v2465_v46 }
0x1384   :  { %3082 = vmatprep.mubr.msk.f32.mxu0 %vm3308_vm5, %v3309_v29 }
0x1456   :  { %v2541_v48 = vpop.f32.mrb[22].mxu0 }
0x1457   :  { %v2542_v49 = vadd.f32 %v2541_v48, %v2470_v50  ;;  %v3079_v52 = vpop.f32.mrb[23].mxu0 }
0x1459   :  { %2546 = vrot.lane.b32.xlu0 %v2542_v49, %s3319_s12 }
0x14cb   :  { %v2547_v55 = vpop.permute.xlu0 %2546 }
0x14cc   :  { %v2549_v57 = vsel %vm382_vm7, %v2370_v54, %v2547_v55 }
0x14cd   :  { %3081 = vmatpush3.msra.mxu0 %v2549_v57 }
0x14ce   :  { %3083 = vmatmul.mubr.msk.f32.vlgmr.msra.gmra.mrb[24].mxu0 %vm761_vm12, %v2550_v56  ;;  %3085 = vmatprep.subr.mxu0 %v3309_v29 }
0x14cf   :  { %3086 = vmatpush3.msra.mxu0 %v2549_v57  ;;  %3087 = vmatprep.mubr.msk.f32.mxu0 %vm3308_vm5, %v3309_v29 }
0x14d2   :  { %3088 = vmatmul.mubr.msk.f32.vlgmr.msra.gmra.mrb[26].mxu0 %vm761_vm12, %v2624_v26 }
0x15a1   :  { %v2620_v58 = vpop.f32.mrb[24].mxu0 }
0x15a2   :  { %v3084_v39 = vpop.f32.mrb[25].mxu0 }
0x15a5   :  { %v2694_v59 = vpop.f32.mrb[26].mxu0 }
0x15a6   :  { %v2698_v60 = vmul.f32 %v2694_v59, %v2620_v58  ;;  %v3089_v62 = vpop.f32.mrb[27].mxu0 }
0x15a8   :  { %v2699_v63 = vsel %vm196_vm4, %v2698_v60, 0.0 }
0x15a9   :  { %2700 = vadd.xlane.f32.xlu1 %v2699_v63 }
0x1636   :  { %v2701_v0 = vpop.xlane.xlu1 %2700 }
0x1637   :  { %2702 = vst [vmem:[%s4134_s22] sm:$0xff] %v2701_v0 }

</bundles_post_ra>
